<compile_context>
chip_gen: v6e
topology: v6e:2x2x1
jax: 0.10.0
libtpu: 0.0.40
codegen_flags: <defaults>
</compile_context>

<pallas_src>
import jax
import jax.numpy as jnp
from jax import lax
from jax.experimental import pallas as pl
from jax.experimental.pallas import tpu as pltpu

INPUT_SIZE = 350
HIDDEN_SIZE = 8
OUTPUT_SIZE = 350
N_FRAMES = 12
D_OUT = OUTPUT_SIZE * N_FRAMES  # 4200


def rnn_fc_kernel(proj_ref, whh_t_ref, wfc_ref, bfc_ref, out_ref):
    """Tanh recurrence + output Linear for one batch tile (batch on lanes).

    proj_ref : (T, H, BT)  time-major pre-projected inputs x_t @ W_ih + (b_ih+b_hh)
    whh_t_ref: (H, H)      TRANSPOSED hidden->hidden weights; column j holds the
                           outgoing weights of hidden unit j (i.e. whh[j, :]).
    wfc_ref  : (H, D_OUT)  fc weights (transposed vs. PyTorch fc.weight)
    bfc_ref  : (1, D_OUT)  fc bias
    out_ref  : (BT, D_OUT)
    """
    T, H, BT = proj_ref.shape

    # Hoist the loop-invariant broadcasts of the 8 recurrent-weight columns to
    # the (H, BT) working shape ONCE.  JAX does not CSE broadcast_in_dim, so
    # doing this inside the (unrolled) step would re-emit up to 64 broadcasts
    # per unrolled block, re-executed T/8 times on the serial path.
    whh_t = whh_t_ref[...]
    whh_cols = [jnp.broadcast_to(whh_t[:, j:j + 1], (H, BT)) for j in range(H)]

    def step(t, h):
        # h, p_t: (H, BT) -- batch on the 128-wide lane axis.
        p_t = proj_ref[t]  # dynamic index on the leading (time) axis
        # 8 independent full-lane FMAs on the VPU; h[j:j+1, :] is a sublane
        # stride-0 broadcast (cheap, no cross-lane XLU work).  An MXU matmul
        # here would put a vmatmul push + result pop on the serial critical
        # path every timestep.
        terms = [whh_cols[j] * h[j:j + 1, :] for j in range(H)]
        # Balanced tree sum: dependent-add depth ~3 instead of a length-8
        # serial chain; the recurrence over T multiplies this latency saving.
        while len(terms) > 1:
            nxt = [terms[i] + terms[i + 1] for i in range(0, len(terms) - 1, 2)]
            if len(terms) % 2:
                nxt.append(terms[-1])
            terms = nxt
        return jnp.tanh(p_t + terms[0])

    h0 = jnp.zeros((H, BT), dtype=jnp.float32)
    # Cap the unroll so long recurrences don't blow up code size / vreg
    # live ranges; tiny T is still effectively fully unrolled.
    h_last = lax.fori_loop(0, T, step, h0, unroll=min(T, 8))

    # Fused output Linear on the last hidden state, contracting the H axis
    # (dim 0 of both operands) -> (BT, D_OUT).  BT = 128-256 rows gives
    # near-full MXU M-fill; D_OUT = 4200 is the full lane extent of the block,
    # so stores are lane-dense apart from the final masked tail.
    out = lax.dot_general(
        h_last, wfc_ref[...],
        dimension_numbers=(((0,), (0,)), ((), ())),
        preferred_element_type=jnp.float32,
    )
    out_ref[...] = out + bfc_ref[...]


def init_params(key):
    """Deterministic init matching the PyTorch module's parameter shapes.

    PyTorch: W_ih (H, D_in), W_hh (H, H), b_ih (H,), b_hh (H,),
             fc.weight (D_OUT, H), fc.bias (D_OUT,)
    Stored here already transposed / combined for the kernel & reference:
      wih (D_in, H), whh (H, H) used as h @ whh, b (1, H) = b_ih + b_hh,
      wfc (H, D_OUT), bfc (1, D_OUT).
    NOTE: real PyTorch weights would need transposing into this convention.
    """
    ks = jax.random.split(key, 6)
    bound = 1.0 / jnp.sqrt(HIDDEN_SIZE)
    wih = jax.random.uniform(ks[0], (INPUT_SIZE, HIDDEN_SIZE), jnp.float32, -bound, bound)
    whh = jax.random.uniform(ks[1], (HIDDEN_SIZE, HIDDEN_SIZE), jnp.float32, -bound, bound)
    b_ih = jax.random.uniform(ks[2], (1, HIDDEN_SIZE), jnp.float32, -bound, bound)
    b_hh = jax.random.uniform(ks[3], (1, HIDDEN_SIZE), jnp.float32, -bound, bound)
    wfc = jax.random.uniform(ks[4], (HIDDEN_SIZE, D_OUT), jnp.float32, -bound, bound)
    bfc = jax.random.uniform(ks[5], (1, D_OUT), jnp.float32, -bound, bound)
    return wih, whh, b_ih + b_hh, wfc, bfc


def _choose_batch_tile(B, T):
    """Pick the batch-tile width (the lane axis inside the kernel).

    Large B: 128/256-lane tiles -> near-full MXU M-fill on the final
    (BT,8)@(8,4200) matmul, lane-dense output DMAs, multiple grid steps for
    pipelining and megacore sharding on v7x.  The double-buffered per-tile
    footprint 2*4*BT*(T*H + D_OUT) bytes is kept within ~24 MiB so it fits the
    scoped-VMEM limit on every generation (v5e default raised to 32 MiB below,
    v7x 64 MiB physical).
    Small B (<=128): one full-extent tile, since a sub-128 lane block is only
    legal at full extent.
    """
    if B > 128:
        bt = 256 if B >= 512 else 128
        while bt > 128 and 8 * bt * (T * HIDDEN_SIZE + D_OUT) > 24 * 1024 * 1024:
            bt //= 2
        return bt
    # TODO(synk): for very long T, split time into an inner "arbitrary" grid
    # axis with the hidden state carried in persistent VMEM scratch so the
    # proj block stays bounded independent of T (v7x 64 MiB VMEM budget).
    return max(8, -(-B // 8) * 8)


def rnn_model_forward(x, params):
    """x: (B, INPUT_SIZE, T) float32 -- same layout as the PyTorch module's input."""
    wih, whh, b, wfc, bfc = params
    B, D_in, T = x.shape
    assert D_in == INPUT_SIZE

    # Hoisted input projection: ONE large GEMM, independent of the recurrence,
    # contracting directly over the channel axis of the original (B, C, T)
    # layout and emitted directly in the time-major, batch-on-lanes (T, H, B)
    # layout the kernel consumes (no extra transpose of proj outside the kernel).
    proj = jnp.einsum('bct,ch->thb', x, wih,
                      preferred_element_type=jnp.float32) + b.reshape(HIDDEN_SIZE, 1)

    BT = _choose_batch_tile(B, T)
    Bp = -(-B // BT) * BT  # pad batch up to a whole number of tiles
    if Bp != B:
        proj = jnp.pad(proj, ((0, 0), (0, 0), (0, Bp - B)))
    grid = (Bp // BT,)

    out = pl.pallas_call(
        rnn_fc_kernel,
        out_shape=jax.ShapeDtypeStruct((Bp, D_OUT), jnp.float32),
        grid_spec=pltpu.PrefetchScalarGridSpec(
            num_scalar_prefetch=0,
            grid=grid,
            in_specs=[
                pl.BlockSpec((T, HIDDEN_SIZE, BT), lambda i: (0, 0, i)),
                pl.BlockSpec((HIDDEN_SIZE, HIDDEN_SIZE), lambda i: (0, 0)),
                pl.BlockSpec((HIDDEN_SIZE, D_OUT), lambda i: (0, 0)),
                pl.BlockSpec((1, D_OUT), lambda i: (0, 0)),
            ],
            out_specs=pl.BlockSpec((BT, D_OUT), lambda i: (i, 0)),
        ),
        compiler_params=pltpu.CompilerParams(
            # Batch tiles are independent: pipeline the proj/out DMAs and shard
            # the grid across both TensorCores on v7x.
            dimension_semantics=("parallel",),
            # The double-buffered proj block is 2*T*8*BT*4 B, which can exceed
            # v5e's 16 MiB default scoped-VMEM limit for long T; 32 MiB is safe
            # on every generation (v7x default scoped is already 32 MiB).
            vmem_limit_bytes=32 * 1024 * 1024,
        ),
    )(proj, jnp.transpose(whh), wfc, bfc)

    if Bp != B:
        out = out[:B]
    return out.reshape(B, OUTPUT_SIZE, N_FRAMES)


def reference_forward(x, params):
    """Pure-JAX reference replicating the PyTorch semantics."""
    wih, whh, b, wfc, bfc = params
    B, _, T = x.shape
    xs = jnp.transpose(x, (0, 2, 1))  # (B, T, D_in)
    h = jnp.zeros((B, HIDDEN_SIZE), jnp.float32)
    for t in range(T):
        h = jnp.tanh(xs[:, t, :] @ wih + h @ whh + b)
    out = h @ wfc + bfc
    return out.reshape(B, OUTPUT_SIZE, N_FRAMES)


if __name__ == "__main__":
    B, T = 16, 8
    key = jax.random.PRNGKey(0)
    k_x, k_p = jax.random.split(key)

    x = jax.random.normal(k_x, (B, INPUT_SIZE, T), dtype=jnp.float32)
    params = init_params(k_p)

    out = rnn_model_forward(x, params)
    out = jax.block_until_ready(out)

    ref = reference_forward(x, params)
    assert out.shape == (B, OUTPUT_SIZE, N_FRAMES), out.shape
    assert jnp.allclose(out, ref, atol=1e-4, rtol=1e-4), "mismatch vs JAX reference"

    print("KERNEL_OK")
</pallas_src>

<mosaic_0001>
module attributes {stable_mosaic.version = 11 : i64} {
  func.func @rnn_fc_kernel(%arg0: i32, %arg1: memref<8x8x16xf32, #tpu.memory_space<vmem>>, %arg2: memref<8x8xf32, #tpu.memory_space<vmem>>, %arg3: memref<8x4200xf32, #tpu.memory_space<vmem>>, %arg4: memref<1x4200xf32, #tpu.memory_space<vmem>>, %arg5: memref<16x4200xf32, #tpu.memory_space<vmem>>) attributes {dimension_semantics = [#tpu.dimension_semantics<parallel>], iteration_bounds = array<i64: 1>, scalar_prefetch = 0 : i64, scratch_operands = 0 : i64, tpu.core_type = #tpu.core_type<tc>, window_params = [{transform_indices = @transform_0, window_bounds = array<i64: 8, 8, 16>}, {pipeline_mode = #tpu.pipeline_mode<synchronous>, transform_indices = @transform_1, window_bounds = array<i64: 8, 8>}, {pipeline_mode = #tpu.pipeline_mode<synchronous>, transform_indices = @transform_2, window_bounds = array<i64: 8, 4200>}, {pipeline_mode = #tpu.pipeline_mode<synchronous>, transform_indices = @transform_3, window_bounds = array<i64: 1, 4200>}, {transform_indices = @transform_4, window_bounds = array<i64: 16, 4200>}]} {
    %c0 = arith.constant 0 : index
    %c0_0 = arith.constant 0 : index
    %0 = vector.load %arg2[%c0, %c0_0] : memref<8x8xf32, #tpu.memory_space<vmem>>, vector<8x8xf32>
    %1 = vector.extract_strided_slice %0 {offsets = [0, 0], sizes = [8, 1], strides = [1, 1]} : vector<8x8xf32> to vector<8x1xf32>
    %2 = vector.shape_cast %1 : vector<8x1xf32> to vector<8x1xf32>
    %3 = vector.broadcast %2 : vector<8x1xf32> to vector<8x16xf32>
    %4 = vector.extract_strided_slice %0 {offsets = [0, 1], sizes = [8, 1], strides = [1, 1]} : vector<8x8xf32> to vector<8x1xf32>
    %5 = vector.shape_cast %4 : vector<8x1xf32> to vector<8x1xf32>
    %6 = vector.broadcast %5 : vector<8x1xf32> to vector<8x16xf32>
    %7 = vector.extract_strided_slice %0 {offsets = [0, 2], sizes = [8, 1], strides = [1, 1]} : vector<8x8xf32> to vector<8x1xf32>
    %8 = vector.shape_cast %7 : vector<8x1xf32> to vector<8x1xf32>
    %9 = vector.broadcast %8 : vector<8x1xf32> to vector<8x16xf32>
    %10 = vector.extract_strided_slice %0 {offsets = [0, 3], sizes = [8, 1], strides = [1, 1]} : vector<8x8xf32> to vector<8x1xf32>
    %11 = vector.shape_cast %10 : vector<8x1xf32> to vector<8x1xf32>
    %12 = vector.broadcast %11 : vector<8x1xf32> to vector<8x16xf32>
    %13 = vector.extract_strided_slice %0 {offsets = [0, 4], sizes = [8, 1], strides = [1, 1]} : vector<8x8xf32> to vector<8x1xf32>
    %14 = vector.shape_cast %13 : vector<8x1xf32> to vector<8x1xf32>
    %15 = vector.broadcast %14 : vector<8x1xf32> to vector<8x16xf32>
    %16 = vector.extract_strided_slice %0 {offsets = [0, 5], sizes = [8, 1], strides = [1, 1]} : vector<8x8xf32> to vector<8x1xf32>
    %17 = vector.shape_cast %16 : vector<8x1xf32> to vector<8x1xf32>
    %18 = vector.broadcast %17 : vector<8x1xf32> to vector<8x16xf32>
    %19 = vector.extract_strided_slice %0 {offsets = [0, 6], sizes = [8, 1], strides = [1, 1]} : vector<8x8xf32> to vector<8x1xf32>
    %20 = vector.shape_cast %19 : vector<8x1xf32> to vector<8x1xf32>
    %21 = vector.broadcast %20 : vector<8x1xf32> to vector<8x16xf32>
    %22 = vector.extract_strided_slice %0 {offsets = [0, 7], sizes = [8, 1], strides = [1, 1]} : vector<8x8xf32> to vector<8x1xf32>
    %23 = vector.shape_cast %22 : vector<8x1xf32> to vector<8x1xf32>
    %24 = vector.broadcast %23 : vector<8x1xf32> to vector<8x16xf32>
    %cst = arith.constant 0.000000e+00 : f32
    %25 = vector.broadcast %cst : f32 to vector<8x16xf32>
    %c0_i32 = arith.constant 0 : i32
    %26 = arith.index_cast %c0_i32 : i32 to index
    %c0_1 = arith.constant 0 : index
    %c0_2 = arith.constant 0 : index
    %27 = vector.load %arg1[%26, %c0_1, %c0_2] : memref<8x8x16xf32, #tpu.memory_space<vmem>>, vector<1x8x16xf32>
    %28 = vector.shape_cast %27 : vector<1x8x16xf32> to vector<8x16xf32>
    %29 = vector.extract_strided_slice %25 {offsets = [0, 0], sizes = [1, 16], strides = [1, 1]} : vector<8x16xf32> to vector<1x16xf32>
    %30 = vector.broadcast %29 : vector<1x16xf32> to vector<8x16xf32>
    %31 = arith.mulf %3, %30 : vector<8x16xf32>
    %32 = vector.extract_strided_slice %25 {offsets = [1, 0], sizes = [1, 16], strides = [1, 1]} : vector<8x16xf32> to vector<1x16xf32>
    %33 = vector.broadcast %32 : vector<1x16xf32> to vector<8x16xf32>
    %34 = arith.mulf %6, %33 : vector<8x16xf32>
    %35 = vector.extract_strided_slice %25 {offsets = [2, 0], sizes = [1, 16], strides = [1, 1]} : vector<8x16xf32> to vector<1x16xf32>
    %36 = vector.broadcast %35 : vector<1x16xf32> to vector<8x16xf32>
    %37 = arith.mulf %9, %36 : vector<8x16xf32>
    %38 = vector.extract_strided_slice %25 {offsets = [3, 0], sizes = [1, 16], strides = [1, 1]} : vector<8x16xf32> to vector<1x16xf32>
    %39 = vector.broadcast %38 : vector<1x16xf32> to vector<8x16xf32>
    %40 = arith.mulf %12, %39 : vector<8x16xf32>
    %41 = vector.extract_strided_slice %25 {offsets = [4, 0], sizes = [1, 16], strides = [1, 1]} : vector<8x16xf32> to vector<1x16xf32>
    %42 = vector.broadcast %41 : vector<1x16xf32> to vector<8x16xf32>
    %43 = arith.mulf %15, %42 : vector<8x16xf32>
    %44 = vector.extract_strided_slice %25 {offsets = [5, 0], sizes = [1, 16], strides = [1, 1]} : vector<8x16xf32> to vector<1x16xf32>
    %45 = vector.broadcast %44 : vector<1x16xf32> to vector<8x16xf32>
    %46 = arith.mulf %18, %45 : vector<8x16xf32>
    %47 = vector.extract_strided_slice %25 {offsets = [6, 0], sizes = [1, 16], strides = [1, 1]} : vector<8x16xf32> to vector<1x16xf32>
    %48 = vector.broadcast %47 : vector<1x16xf32> to vector<8x16xf32>
    %49 = arith.mulf %21, %48 : vector<8x16xf32>
    %50 = vector.extract_strided_slice %25 {offsets = [7, 0], sizes = [1, 16], strides = [1, 1]} : vector<8x16xf32> to vector<1x16xf32>
    %51 = vector.broadcast %50 : vector<1x16xf32> to vector<8x16xf32>
    %52 = arith.mulf %24, %51 : vector<8x16xf32>
    %53 = arith.addf %31, %34 : vector<8x16xf32>
    %54 = arith.addf %37, %40 : vector<8x16xf32>
    %55 = arith.addf %43, %46 : vector<8x16xf32>
    %56 = arith.addf %49, %52 : vector<8x16xf32>
    %57 = arith.addf %53, %54 : vector<8x16xf32>
    %58 = arith.addf %55, %56 : vector<8x16xf32>
    %59 = arith.addf %57, %58 : vector<8x16xf32>
    %60 = arith.addf %28, %59 : vector<8x16xf32>
    %61 = math.tanh %60 : vector<8x16xf32>
    %c1_i32 = arith.constant 1 : i32
    %62 = arith.index_cast %c1_i32 : i32 to index
    %c0_3 = arith.constant 0 : index
    %c0_4 = arith.constant 0 : index
    %63 = vector.load %arg1[%62, %c0_3, %c0_4] : memref<8x8x16xf32, #tpu.memory_space<vmem>>, vector<1x8x16xf32>
    %64 = vector.shape_cast %63 : vector<1x8x16xf32> to vector<8x16xf32>
    %65 = vector.extract_strided_slice %61 {offsets = [0, 0], sizes = [1, 16], strides = [1, 1]} : vector<8x16xf32> to vector<1x16xf32>
    %66 = vector.broadcast %65 : vector<1x16xf32> to vector<8x16xf32>
    %67 = arith.mulf %3, %66 : vector<8x16xf32>
    %68 = vector.extract_strided_slice %61 {offsets = [1, 0], sizes = [1, 16], strides = [1, 1]} : vector<8x16xf32> to vector<1x16xf32>
    %69 = vector.broadcast %68 : vector<1x16xf32> to vector<8x16xf32>
    %70 = arith.mulf %6, %69 : vector<8x16xf32>
    %71 = vector.extract_strided_slice %61 {offsets = [2, 0], sizes = [1, 16], strides = [1, 1]} : vector<8x16xf32> to vector<1x16xf32>
    %72 = vector.broadcast %71 : vector<1x16xf32> to vector<8x16xf32>
    %73 = arith.mulf %9, %72 : vector<8x16xf32>
    %74 = vector.extract_strided_slice %61 {offsets = [3, 0], sizes = [1, 16], strides = [1, 1]} : vector<8x16xf32> to vector<1x16xf32>
    %75 = vector.broadcast %74 : vector<1x16xf32> to vector<8x16xf32>
    %76 = arith.mulf %12, %75 : vector<8x16xf32>
    %77 = vector.extract_strided_slice %61 {offsets = [4, 0], sizes = [1, 16], strides = [1, 1]} : vector<8x16xf32> to vector<1x16xf32>
    %78 = vector.broadcast %77 : vector<1x16xf32> to vector<8x16xf32>
    %79 = arith.mulf %15, %78 : vector<8x16xf32>
    %80 = vector.extract_strided_slice %61 {offsets = [5, 0], sizes = [1, 16], strides = [1, 1]} : vector<8x16xf32> to vector<1x16xf32>
    %81 = vector.broadcast %80 : vector<1x16xf32> to vector<8x16xf32>
    %82 = arith.mulf %18, %81 : vector<8x16xf32>
    %83 = vector.extract_strided_slice %61 {offsets = [6, 0], sizes = [1, 16], strides = [1, 1]} : vector<8x16xf32> to vector<1x16xf32>
    %84 = vector.broadcast %83 : vector<1x16xf32> to vector<8x16xf32>
    %85 = arith.mulf %21, %84 : vector<8x16xf32>
    %86 = vector.extract_strided_slice %61 {offsets = [7, 0], sizes = [1, 16], strides = [1, 1]} : vector<8x16xf32> to vector<1x16xf32>
    %87 = vector.broadcast %86 : vector<1x16xf32> to vector<8x16xf32>
    %88 = arith.mulf %24, %87 : vector<8x16xf32>
    %89 = arith.addf %67, %70 : vector<8x16xf32>
    %90 = arith.addf %73, %76 : vector<8x16xf32>
    %91 = arith.addf %79, %82 : vector<8x16xf32>
    %92 = arith.addf %85, %88 : vector<8x16xf32>
    %93 = arith.addf %89, %90 : vector<8x16xf32>
    %94 = arith.addf %91, %92 : vector<8x16xf32>
    %95 = arith.addf %93, %94 : vector<8x16xf32>
    %96 = arith.addf %64, %95 : vector<8x16xf32>
    %97 = math.tanh %96 : vector<8x16xf32>
    %c2_i32 = arith.constant 2 : i32
    %98 = arith.index_cast %c2_i32 : i32 to index
    %c0_5 = arith.constant 0 : index
    %c0_6 = arith.constant 0 : index
    %99 = vector.load %arg1[%98, %c0_5, %c0_6] : memref<8x8x16xf32, #tpu.memory_space<vmem>>, vector<1x8x16xf32>
    %100 = vector.shape_cast %99 : vector<1x8x16xf32> to vector<8x16xf32>
    %101 = vector.extract_strided_slice %97 {offsets = [0, 0], sizes = [1, 16], strides = [1, 1]} : vector<8x16xf32> to vector<1x16xf32>
    %102 = vector.broadcast %101 : vector<1x16xf32> to vector<8x16xf32>
    %103 = arith.mulf %3, %102 : vector<8x16xf32>
    %104 = vector.extract_strided_slice %97 {offsets = [1, 0], sizes = [1, 16], strides = [1, 1]} : vector<8x16xf32> to vector<1x16xf32>
    %105 = vector.broadcast %104 : vector<1x16xf32> to vector<8x16xf32>
    %106 = arith.mulf %6, %105 : vector<8x16xf32>
    %107 = vector.extract_strided_slice %97 {offsets = [2, 0], sizes = [1, 16], strides = [1, 1]} : vector<8x16xf32> to vector<1x16xf32>
    %108 = vector.broadcast %107 : vector<1x16xf32> to vector<8x16xf32>
    %109 = arith.mulf %9, %108 : vector<8x16xf32>
    %110 = vector.extract_strided_slice %97 {offsets = [3, 0], sizes = [1, 16], strides = [1, 1]} : vector<8x16xf32> to vector<1x16xf32>
    %111 = vector.broadcast %110 : vector<1x16xf32> to vector<8x16xf32>
    %112 = arith.mulf %12, %111 : vector<8x16xf32>
    %113 = vector.extract_strided_slice %97 {offsets = [4, 0], sizes = [1, 16], strides = [1, 1]} : vector<8x16xf32> to vector<1x16xf32>
    %114 = vector.broadcast %113 : vector<1x16xf32> to vector<8x16xf32>
    %115 = arith.mulf %15, %114 : vector<8x16xf32>
    %116 = vector.extract_strided_slice %97 {offsets = [5, 0], sizes = [1, 16], strides = [1, 1]} : vector<8x16xf32> to vector<1x16xf32>
    %117 = vector.broadcast %116 : vector<1x16xf32> to vector<8x16xf32>
    %118 = arith.mulf %18, %117 : vector<8x16xf32>
    %119 = vector.extract_strided_slice %97 {offsets = [6, 0], sizes = [1, 16], strides = [1, 1]} : vector<8x16xf32> to vector<1x16xf32>
    %120 = vector.broadcast %119 : vector<1x16xf32> to vector<8x16xf32>
    %121 = arith.mulf %21, %120 : vector<8x16xf32>
    %122 = vector.extract_strided_slice %97 {offsets = [7, 0], sizes = [1, 16], strides = [1, 1]} : vector<8x16xf32> to vector<1x16xf32>
    %123 = vector.broadcast %122 : vector<1x16xf32> to vector<8x16xf32>
    %124 = arith.mulf %24, %123 : vector<8x16xf32>
    %125 = arith.addf %103, %106 : vector<8x16xf32>
    %126 = arith.addf %109, %112 : vector<8x16xf32>
    %127 = arith.addf %115, %118 : vector<8x16xf32>
    %128 = arith.addf %121, %124 : vector<8x16xf32>
    %129 = arith.addf %125, %126 : vector<8x16xf32>
    %130 = arith.addf %127, %128 : vector<8x16xf32>
    %131 = arith.addf %129, %130 : vector<8x16xf32>
    %132 = arith.addf %100, %131 : vector<8x16xf32>
    %133 = math.tanh %132 : vector<8x16xf32>
    %c3_i32 = arith.constant 3 : i32
    %134 = arith.index_cast %c3_i32 : i32 to index
    %c0_7 = arith.constant 0 : index
    %c0_8 = arith.constant 0 : index
    %135 = vector.load %arg1[%134, %c0_7, %c0_8] : memref<8x8x16xf32, #tpu.memory_space<vmem>>, vector<1x8x16xf32>
    %136 = vector.shape_cast %135 : vector<1x8x16xf32> to vector<8x16xf32>
    %137 = vector.extract_strided_slice %133 {offsets = [0, 0], sizes = [1, 16], strides = [1, 1]} : vector<8x16xf32> to vector<1x16xf32>
    %138 = vector.broadcast %137 : vector<1x16xf32> to vector<8x16xf32>
    %139 = arith.mulf %3, %138 : vector<8x16xf32>
    %140 = vector.extract_strided_slice %133 {offsets = [1, 0], sizes = [1, 16], strides = [1, 1]} : vector<8x16xf32> to vector<1x16xf32>
    %141 = vector.broadcast %140 : vector<1x16xf32> to vector<8x16xf32>
    %142 = arith.mulf %6, %141 : vector<8x16xf32>
    %143 = vector.extract_strided_slice %133 {offsets = [2, 0], sizes = [1, 16], strides = [1, 1]} : vector<8x16xf32> to vector<1x16xf32>
    %144 = vector.broadcast %143 : vector<1x16xf32> to vector<8x16xf32>
    %145 = arith.mulf %9, %144 : vector<8x16xf32>
    %146 = vector.extract_strided_slice %133 {offsets = [3, 0], sizes = [1, 16], strides = [1, 1]} : vector<8x16xf32> to vector<1x16xf32>
    %147 = vector.broadcast %146 : vector<1x16xf32> to vector<8x16xf32>
    %148 = arith.mulf %12, %147 : vector<8x16xf32>
    %149 = vector.extract_strided_slice %133 {offsets = [4, 0], sizes = [1, 16], strides = [1, 1]} : vector<8x16xf32> to vector<1x16xf32>
    %150 = vector.broadcast %149 : vector<1x16xf32> to vector<8x16xf32>
    %151 = arith.mulf %15, %150 : vector<8x16xf32>
    %152 = vector.extract_strided_slice %133 {offsets = [5, 0], sizes = [1, 16], strides = [1, 1]} : vector<8x16xf32> to vector<1x16xf32>
    %153 = vector.broadcast %152 : vector<1x16xf32> to vector<8x16xf32>
    %154 = arith.mulf %18, %153 : vector<8x16xf32>
    %155 = vector.extract_strided_slice %133 {offsets = [6, 0], sizes = [1, 16], strides = [1, 1]} : vector<8x16xf32> to vector<1x16xf32>
    %156 = vector.broadcast %155 : vector<1x16xf32> to vector<8x16xf32>
    %157 = arith.mulf %21, %156 : vector<8x16xf32>
    %158 = vector.extract_strided_slice %133 {offsets = [7, 0], sizes = [1, 16], strides = [1, 1]} : vector<8x16xf32> to vector<1x16xf32>
    %159 = vector.broadcast %158 : vector<1x16xf32> to vector<8x16xf32>
    %160 = arith.mulf %24, %159 : vector<8x16xf32>
    %161 = arith.addf %139, %142 : vector<8x16xf32>
    %162 = arith.addf %145, %148 : vector<8x16xf32>
    %163 = arith.addf %151, %154 : vector<8x16xf32>
    %164 = arith.addf %157, %160 : vector<8x16xf32>
    %165 = arith.addf %161, %162 : vector<8x16xf32>
    %166 = arith.addf %163, %164 : vector<8x16xf32>
    %167 = arith.addf %165, %166 : vector<8x16xf32>
    %168 = arith.addf %136, %167 : vector<8x16xf32>
    %169 = math.tanh %168 : vector<8x16xf32>
    %c4_i32 = arith.constant 4 : i32
    %170 = arith.index_cast %c4_i32 : i32 to index
    %c0_9 = arith.constant 0 : index
    %c0_10 = arith.constant 0 : index
    %171 = vector.load %arg1[%170, %c0_9, %c0_10] : memref<8x8x16xf32, #tpu.memory_space<vmem>>, vector<1x8x16xf32>
    %172 = vector.shape_cast %171 : vector<1x8x16xf32> to vector<8x16xf32>
    %173 = vector.extract_strided_slice %169 {offsets = [0, 0], sizes = [1, 16], strides = [1, 1]} : vector<8x16xf32> to vector<1x16xf32>
    %174 = vector.broadcast %173 : vector<1x16xf32> to vector<8x16xf32>
    %175 = arith.mulf %3, %174 : vector<8x16xf32>
    %176 = vector.extract_strided_slice %169 {offsets = [1, 0], sizes = [1, 16], strides = [1, 1]} : vector<8x16xf32> to vector<1x16xf32>
    %177 = vector.broadcast %176 : vector<1x16xf32> to vector<8x16xf32>
    %178 = arith.mulf %6, %177 : vector<8x16xf32>
    %179 = vector.extract_strided_slice %169 {offsets = [2, 0], sizes = [1, 16], strides = [1, 1]} : vector<8x16xf32> to vector<1x16xf32>
    %180 = vector.broadcast %179 : vector<1x16xf32> to vector<8x16xf32>
    %181 = arith.mulf %9, %180 : vector<8x16xf32>
    %182 = vector.extract_strided_slice %169 {offsets = [3, 0], sizes = [1, 16], strides = [1, 1]} : vector<8x16xf32> to vector<1x16xf32>
    %183 = vector.broadcast %182 : vector<1x16xf32> to vector<8x16xf32>
    %184 = arith.mulf %12, %183 : vector<8x16xf32>
    %185 = vector.extract_strided_slice %169 {offsets = [4, 0], sizes = [1, 16], strides = [1, 1]} : vector<8x16xf32> to vector<1x16xf32>
    %186 = vector.broadcast %185 : vector<1x16xf32> to vector<8x16xf32>
    %187 = arith.mulf %15, %186 : vector<8x16xf32>
    %188 = vector.extract_strided_slice %169 {offsets = [5, 0], sizes = [1, 16], strides = [1, 1]} : vector<8x16xf32> to vector<1x16xf32>
    %189 = vector.broadcast %188 : vector<1x16xf32> to vector<8x16xf32>
    %190 = arith.mulf %18, %189 : vector<8x16xf32>
    %191 = vector.extract_strided_slice %169 {offsets = [6, 0], sizes = [1, 16], strides = [1, 1]} : vector<8x16xf32> to vector<1x16xf32>
    %192 = vector.broadcast %191 : vector<1x16xf32> to vector<8x16xf32>
    %193 = arith.mulf %21, %192 : vector<8x16xf32>
    %194 = vector.extract_strided_slice %169 {offsets = [7, 0], sizes = [1, 16], strides = [1, 1]} : vector<8x16xf32> to vector<1x16xf32>
    %195 = vector.broadcast %194 : vector<1x16xf32> to vector<8x16xf32>
    %196 = arith.mulf %24, %195 : vector<8x16xf32>
    %197 = arith.addf %175, %178 : vector<8x16xf32>
    %198 = arith.addf %181, %184 : vector<8x16xf32>
    %199 = arith.addf %187, %190 : vector<8x16xf32>
    %200 = arith.addf %193, %196 : vector<8x16xf32>
    %201 = arith.addf %197, %198 : vector<8x16xf32>
    %202 = arith.addf %199, %200 : vector<8x16xf32>
    %203 = arith.addf %201, %202 : vector<8x16xf32>
    %204 = arith.addf %172, %203 : vector<8x16xf32>
    %205 = math.tanh %204 : vector<8x16xf32>
    %c5_i32 = arith.constant 5 : i32
    %206 = arith.index_cast %c5_i32 : i32 to index
    %c0_11 = arith.constant 0 : index
    %c0_12 = arith.constant 0 : index
    %207 = vector.load %arg1[%206, %c0_11, %c0_12] : memref<8x8x16xf32, #tpu.memory_space<vmem>>, vector<1x8x16xf32>
    %208 = vector.shape_cast %207 : vector<1x8x16xf32> to vector<8x16xf32>
    %209 = vector.extract_strided_slice %205 {offsets = [0, 0], sizes = [1, 16], strides = [1, 1]} : vector<8x16xf32> to vector<1x16xf32>
    %210 = vector.broadcast %209 : vector<1x16xf32> to vector<8x16xf32>
    %211 = arith.mulf %3, %210 : vector<8x16xf32>
    %212 = vector.extract_strided_slice %205 {offsets = [1, 0], sizes = [1, 16], strides = [1, 1]} : vector<8x16xf32> to vector<1x16xf32>
    %213 = vector.broadcast %212 : vector<1x16xf32> to vector<8x16xf32>
    %214 = arith.mulf %6, %213 : vector<8x16xf32>
    %215 = vector.extract_strided_slice %205 {offsets = [2, 0], sizes = [1, 16], strides = [1, 1]} : vector<8x16xf32> to vector<1x16xf32>
    %216 = vector.broadcast %215 : vector<1x16xf32> to vector<8x16xf32>
    %217 = arith.mulf %9, %216 : vector<8x16xf32>
    %218 = vector.extract_strided_slice %205 {offsets = [3, 0], sizes = [1, 16], strides = [1, 1]} : vector<8x16xf32> to vector<1x16xf32>
    %219 = vector.broadcast %218 : vector<1x16xf32> to vector<8x16xf32>
    %220 = arith.mulf %12, %219 : vector<8x16xf32>
    %221 = vector.extract_strided_slice %205 {offsets = [4, 0], sizes = [1, 16], strides = [1, 1]} : vector<8x16xf32> to vector<1x16xf32>
    %222 = vector.broadcast %221 : vector<1x16xf32> to vector<8x16xf32>
    %223 = arith.mulf %15, %222 : vector<8x16xf32>
    %224 = vector.extract_strided_slice %205 {offsets = [5, 0], sizes = [1, 16], strides = [1, 1]} : vector<8x16xf32> to vector<1x16xf32>
    %225 = vector.broadcast %224 : vector<1x16xf32> to vector<8x16xf32>
    %226 = arith.mulf %18, %225 : vector<8x16xf32>
    %227 = vector.extract_strided_slice %205 {offsets = [6, 0], sizes = [1, 16], strides = [1, 1]} : vector<8x16xf32> to vector<1x16xf32>
    %228 = vector.broadcast %227 : vector<1x16xf32> to vector<8x16xf32>
    %229 = arith.mulf %21, %228 : vector<8x16xf32>
    %230 = vector.extract_strided_slice %205 {offsets = [7, 0], sizes = [1, 16], strides = [1, 1]} : vector<8x16xf32> to vector<1x16xf32>
    %231 = vector.broadcast %230 : vector<1x16xf32> to vector<8x16xf32>
    %232 = arith.mulf %24, %231 : vector<8x16xf32>
    %233 = arith.addf %211, %214 : vector<8x16xf32>
    %234 = arith.addf %217, %220 : vector<8x16xf32>
    %235 = arith.addf %223, %226 : vector<8x16xf32>
    %236 = arith.addf %229, %232 : vector<8x16xf32>
    %237 = arith.addf %233, %234 : vector<8x16xf32>
    %238 = arith.addf %235, %236 : vector<8x16xf32>
    %239 = arith.addf %237, %238 : vector<8x16xf32>
    %240 = arith.addf %208, %239 : vector<8x16xf32>
    %241 = math.tanh %240 : vector<8x16xf32>
    %c6_i32 = arith.constant 6 : i32
    %242 = arith.index_cast %c6_i32 : i32 to index
    %c0_13 = arith.constant 0 : index
    %c0_14 = arith.constant 0 : index
    %243 = vector.load %arg1[%242, %c0_13, %c0_14] : memref<8x8x16xf32, #tpu.memory_space<vmem>>, vector<1x8x16xf32>
    %244 = vector.shape_cast %243 : vector<1x8x16xf32> to vector<8x16xf32>
    %245 = vector.extract_strided_slice %241 {offsets = [0, 0], sizes = [1, 16], strides = [1, 1]} : vector<8x16xf32> to vector<1x16xf32>
    %246 = vector.broadcast %245 : vector<1x16xf32> to vector<8x16xf32>
    %247 = arith.mulf %3, %246 : vector<8x16xf32>
    %248 = vector.extract_strided_slice %241 {offsets = [1, 0], sizes = [1, 16], strides = [1, 1]} : vector<8x16xf32> to vector<1x16xf32>
    %249 = vector.broadcast %248 : vector<1x16xf32> to vector<8x16xf32>
    %250 = arith.mulf %6, %249 : vector<8x16xf32>
    %251 = vector.extract_strided_slice %241 {offsets = [2, 0], sizes = [1, 16], strides = [1, 1]} : vector<8x16xf32> to vector<1x16xf32>
    %252 = vector.broadcast %251 : vector<1x16xf32> to vector<8x16xf32>
    %253 = arith.mulf %9, %252 : vector<8x16xf32>
    %254 = vector.extract_strided_slice %241 {offsets = [3, 0], sizes = [1, 16], strides = [1, 1]} : vector<8x16xf32> to vector<1x16xf32>
    %255 = vector.broadcast %254 : vector<1x16xf32> to vector<8x16xf32>
    %256 = arith.mulf %12, %255 : vector<8x16xf32>
    %257 = vector.extract_strided_slice %241 {offsets = [4, 0], sizes = [1, 16], strides = [1, 1]} : vector<8x16xf32> to vector<1x16xf32>
    %258 = vector.broadcast %257 : vector<1x16xf32> to vector<8x16xf32>
    %259 = arith.mulf %15, %258 : vector<8x16xf32>
    %260 = vector.extract_strided_slice %241 {offsets = [5, 0], sizes = [1, 16], strides = [1, 1]} : vector<8x16xf32> to vector<1x16xf32>
    %261 = vector.broadcast %260 : vector<1x16xf32> to vector<8x16xf32>
    %262 = arith.mulf %18, %261 : vector<8x16xf32>
    %263 = vector.extract_strided_slice %241 {offsets = [6, 0], sizes = [1, 16], strides = [1, 1]} : vector<8x16xf32> to vector<1x16xf32>
    %264 = vector.broadcast %263 : vector<1x16xf32> to vector<8x16xf32>
    %265 = arith.mulf %21, %264 : vector<8x16xf32>
    %266 = vector.extract_strided_slice %241 {offsets = [7, 0], sizes = [1, 16], strides = [1, 1]} : vector<8x16xf32> to vector<1x16xf32>
    %267 = vector.broadcast %266 : vector<1x16xf32> to vector<8x16xf32>
    %268 = arith.mulf %24, %267 : vector<8x16xf32>
    %269 = arith.addf %247, %250 : vector<8x16xf32>
    %270 = arith.addf %253, %256 : vector<8x16xf32>
    %271 = arith.addf %259, %262 : vector<8x16xf32>
    %272 = arith.addf %265, %268 : vector<8x16xf32>
    %273 = arith.addf %269, %270 : vector<8x16xf32>
    %274 = arith.addf %271, %272 : vector<8x16xf32>
    %275 = arith.addf %273, %274 : vector<8x16xf32>
    %276 = arith.addf %244, %275 : vector<8x16xf32>
    %277 = math.tanh %276 : vector<8x16xf32>
    %c7_i32 = arith.constant 7 : i32
    %278 = arith.index_cast %c7_i32 : i32 to index
    %c0_15 = arith.constant 0 : index
    %c0_16 = arith.constant 0 : index
    %279 = vector.load %arg1[%278, %c0_15, %c0_16] : memref<8x8x16xf32, #tpu.memory_space<vmem>>, vector<1x8x16xf32>
    %280 = vector.shape_cast %279 : vector<1x8x16xf32> to vector<8x16xf32>
    %281 = vector.extract_strided_slice %277 {offsets = [0, 0], sizes = [1, 16], strides = [1, 1]} : vector<8x16xf32> to vector<1x16xf32>
    %282 = vector.broadcast %281 : vector<1x16xf32> to vector<8x16xf32>
    %283 = arith.mulf %3, %282 : vector<8x16xf32>
    %284 = vector.extract_strided_slice %277 {offsets = [1, 0], sizes = [1, 16], strides = [1, 1]} : vector<8x16xf32> to vector<1x16xf32>
    %285 = vector.broadcast %284 : vector<1x16xf32> to vector<8x16xf32>
    %286 = arith.mulf %6, %285 : vector<8x16xf32>
    %287 = vector.extract_strided_slice %277 {offsets = [2, 0], sizes = [1, 16], strides = [1, 1]} : vector<8x16xf32> to vector<1x16xf32>
    %288 = vector.broadcast %287 : vector<1x16xf32> to vector<8x16xf32>
    %289 = arith.mulf %9, %288 : vector<8x16xf32>
    %290 = vector.extract_strided_slice %277 {offsets = [3, 0], sizes = [1, 16], strides = [1, 1]} : vector<8x16xf32> to vector<1x16xf32>
    %291 = vector.broadcast %290 : vector<1x16xf32> to vector<8x16xf32>
    %292 = arith.mulf %12, %291 : vector<8x16xf32>
    %293 = vector.extract_strided_slice %277 {offsets = [4, 0], sizes = [1, 16], strides = [1, 1]} : vector<8x16xf32> to vector<1x16xf32>
    %294 = vector.broadcast %293 : vector<1x16xf32> to vector<8x16xf32>
    %295 = arith.mulf %15, %294 : vector<8x16xf32>
    %296 = vector.extract_strided_slice %277 {offsets = [5, 0], sizes = [1, 16], strides = [1, 1]} : vector<8x16xf32> to vector<1x16xf32>
    %297 = vector.broadcast %296 : vector<1x16xf32> to vector<8x16xf32>
    %298 = arith.mulf %18, %297 : vector<8x16xf32>
    %299 = vector.extract_strided_slice %277 {offsets = [6, 0], sizes = [1, 16], strides = [1, 1]} : vector<8x16xf32> to vector<1x16xf32>
    %300 = vector.broadcast %299 : vector<1x16xf32> to vector<8x16xf32>
    %301 = arith.mulf %21, %300 : vector<8x16xf32>
    %302 = vector.extract_strided_slice %277 {offsets = [7, 0], sizes = [1, 16], strides = [1, 1]} : vector<8x16xf32> to vector<1x16xf32>
    %303 = vector.broadcast %302 : vector<1x16xf32> to vector<8x16xf32>
    %304 = arith.mulf %24, %303 : vector<8x16xf32>
    %305 = arith.addf %283, %286 : vector<8x16xf32>
    %306 = arith.addf %289, %292 : vector<8x16xf32>
    %307 = arith.addf %295, %298 : vector<8x16xf32>
    %308 = arith.addf %301, %304 : vector<8x16xf32>
    %309 = arith.addf %305, %306 : vector<8x16xf32>
    %310 = arith.addf %307, %308 : vector<8x16xf32>
    %311 = arith.addf %309, %310 : vector<8x16xf32>
    %312 = arith.addf %280, %311 : vector<8x16xf32>
    %313 = math.tanh %312 : vector<8x16xf32>
    %c8_i32 = arith.constant 8 : i32
    %c0_17 = arith.constant 0 : index
    %c0_18 = arith.constant 0 : index
    %314 = vector.load %arg3[%c0_17, %c0_18] : memref<8x4200xf32, #tpu.memory_space<vmem>>, vector<8x4200xf32>
    %cst_19 = arith.constant dense<0.000000e+00> : vector<16x4200xf32>
    %315 = tpu.matmul %313, %314, %cst_19 {dimension_numbers = #tpu.dot_dimension_numbers<[0], [0], [1], [1], [0, 1, 1, 1], [], []>} : vector<8x16xf32>, vector<8x4200xf32>, vector<16x4200xf32> -> vector<16x4200xf32>
    %c0_20 = arith.constant 0 : index
    %c0_21 = arith.constant 0 : index
    %316 = vector.load %arg4[%c0_20, %c0_21] : memref<1x4200xf32, #tpu.memory_space<vmem>>, vector<1x4200xf32>
    %317 = vector.broadcast %316 : vector<1x4200xf32> to vector<16x4200xf32>
    %318 = arith.addf %315, %317 : vector<16x4200xf32>
    %c0_22 = arith.constant 0 : index
    %c0_23 = arith.constant 0 : index
    %319 = vector.load %arg5[%c0_22, %c0_23] : memref<16x4200xf32, #tpu.memory_space<vmem>>, vector<16x4200xf32>
    tpu.vector_store %arg5[%c0_22, %c0_23], %318 {strides = array<i32>} : memref<16x4200xf32, #tpu.memory_space<vmem>>, vector<16x4200xf32>,
    return
  }
  func.func @transform_0(%arg0: i32) -> (i32, i32, i32) {
    %c0_i32 = arith.constant 0 : i32
    %c0_i32_0 = arith.constant 0 : i32
    %c0_i32_1 = arith.constant 0 : i32
    return %c0_i32, %c0_i32_0, %arg0 : i32, i32, i32
  }
  func.func @transform_1(%arg0: i32) -> (i32, i32) {
    %c0_i32 = arith.constant 0 : i32
    %c0_i32_0 = arith.constant 0 : i32
    %c0_i32_1 = arith.constant 0 : i32
    return %c0_i32, %c0_i32_0 : i32, i32
  }
  func.func @transform_2(%arg0: i32) -> (i32, i32) {
    %c0_i32 = arith.constant 0 : i32
    %c0_i32_0 = arith.constant 0 : i32
    %c0_i32_1 = arith.constant 0 : i32
    return %c0_i32, %c0_i32_0 : i32, i32
  }
  func.func @transform_3(%arg0: i32) -> (i32, i32) {
    %c0_i32 = arith.constant 0 : i32
    %c0_i32_0 = arith.constant 0 : i32
    %c0_i32_1 = arith.constant 0 : i32
    return %c0_i32, %c0_i32_0 : i32, i32
  }
  func.func @transform_4(%arg0: i32) -> (i32, i32) {
    %c0_i32 = arith.constant 0 : i32
    %c0_i32_0 = arith.constant 0 : i32
    return %arg0, %c0_i32 : i32, i32
  }
}

</mosaic_0001>

<bundles_post_ra>
// kernel: tpu_custom_call.1
= control target key start
LH: loop header
LB: loop body
LE: loop exit
PB: predicated region body
PF: predicated region fallthrough
CT: control target
= control target key end

     0   :  { %9 = vsyncpa [#allocation3], 0  ;;  %s2658_s0 = inlined_call_operand.hbm [shape: f32[8,8,16], index: 0, kind: input, shape index: {}]   ;;  %s2659_s1 = inlined_call_operand.hbm [shape: f32[8,8], index: 1, kind: input, shape index: {}]   ;;  %s2660_s2 = inlined_call_operand.hbm [shape: f32[8,4200], index: 2, kind: input, shape index: {}]   ;;  %s2661_s3 = inlined_call_operand.hbm [shape: f32[1,4200], index: 3, kind: input, shape index: {}]   ;;  %s2662_s4 = inlined_call_operand.hbm [shape: f32[16,4200], index: 4, kind: output, shape index: {}]  }
   0x1   :  { %10 = vsyncpa [#allocation6], 0 }
   0x2   :  { %11 = vsyncpa [#allocation9], 0 }
   0x3   :  { %12 = vsyncpa [#allocation4], 0  ;;  %s2310_s15 = smov [#allocation5]   ;;  %s2311_s17 = smov [#allocation2]  }
   0x4   :  { %s31_s16 = sshll.u32 %s2310_s15, 4  ;;  %s18_s18 = sshll.u32 %s2311_s17, 4  ;;  %s32_s16 = int_to_ptr.vmem [resolvable:$true] %s31_s16  ;;  %s19_s18 = int_to_ptr.vmem [resolvable:$true] %s18_s18 }
   0x5   :  { %s2210_s19 = scalar_lea.vmem %s32_s16, 128  ;;  %p2215_p1 = scmp.lt.s32.totalorder %s32_s16, %s32_s16 }
   0x6   :  { %p2211_p0 = scmp.ne.s32.totalorder %s32_s16, %s2210_s19  ;;  %p2216_p2 = scmp.lt.s32.totalorder %s2210_s19, %s2210_s19 }
   0x8   :  { %p2217_p3 = por %p2216_p2, %p2215_p1 }
   0xa   :  { %p2218_p4 = pnand %p2217_p3, %p2211_p0 }
   0xc   :  { %2221 = shalt.err (!%p2218_p4)
}
   0xd   :  { %34 = dma.hbm_to_vmem [thread:$0]  %s2659_s1, 128, %s32_s16, [#allocation6]  }
   0xe   :  { %s2230_s22 = scalar_lea.vmem %s19_s18, 1024  ;;  %p2235_p6 = scmp.lt.s32.totalorder %s19_s18, %s19_s18 }
   0xf   :  { %p2231_p5 = scmp.ne.s32.totalorder %s19_s18, %s2230_s22  ;;  %p2236_p7 = scmp.lt.s32.totalorder %s2230_s22, %s2230_s22 }
  0x11   :  { %p2237_p8 = por %p2236_p7, %p2235_p6 }
  0x13   :  { %p2238_p9 = pnand %p2237_p8, %p2231_p5 }
  0x15   :  { %2241 = shalt.err (!%p2238_p9)
}
  0x16   :  { %s2312_s23 = smov 128   ;;  %s2313_s24 = smov 8  }
  0x17   :  { %24 = dma.hbm_to_vmem [thread:$0]  %s2658_s0, 1024, %s19_s18, [#allocation3], %s2312_s23, %s2312_s23, %s2313_s24  }
  0x18   :  { %s2314_s27 = smov [#allocation7]   ;;  %s2315_s29 = smov [#allocation8]  }
  0x19   :  { %s41_s28 = sshll.u32 %s2314_s27, 4  ;;  %s51_s30 = sshll.u32 %s2315_s29, 4  ;;  %s42_s28 = int_to_ptr.vmem [resolvable:$true] %s41_s28  ;;  %s52_s30 = int_to_ptr.vmem [resolvable:$true] %s51_s30 }
  0x1a   :  { %s2250_s1 = scalar_lea.vmem %s42_s28, 4224  ;;  %p2255_p11 = scmp.lt.s32.totalorder %s42_s28, %s42_s28 }
  0x1b   :  { %p2251_p10 = scmp.ne.s32.totalorder %s42_s28, %s2250_s1  ;;  %p2256_p12 = scmp.lt.s32.totalorder %s2250_s1, %s2250_s1 }
  0x1d   :  { %p2257_p13 = por %p2256_p12, %p2255_p11 }
  0x1f   :  { %p2258_p0 = pnand %p2257_p13, %p2251_p10 }
  0x21   :  { %2261 = shalt.err (!%p2258_p0)
}
  0x22   :  { %44 = dma.hbm_to_vmem [thread:$0]  %s2660_s2, 4224, %s42_s28, [#allocation6]  }
  0x23   :  { %s2270_s7 = scalar_lea.vmem %s52_s30, 528  ;;  %s2274_s0 = scalar_lea.vmem %s52_s30, 544 }
  0x24   :  { %p2271_p1 = scmp.ne.s32.totalorder %s52_s30, %s2270_s7  ;;  %p2275_p2 = scmp.lt.s32.totalorder %s52_s30, %s52_s30 }
  0x25   :  { %p2276_p3 = scmp.lt.s32.totalorder %s2274_s0, %s2270_s7 }
  0x27   :  { %p2277_p4 = por %p2276_p3, %p2275_p2 }
  0x29   :  { %p2278_p5 = pnand %p2277_p4, %p2271_p1 }
  0x2b   :  { %2281 = shalt.err (!%p2278_p5)
}
  0x2c   :  { %54 = dma.hbm_to_vmem [thread:$0]  %s2661_s3, 528, %s52_s30, [#allocation9]  }
  0x2d   :  { %2302 = dma.done.wait [#allocation3], 1024  }
  0x2e   :  { %2303 = vsyncadd [#allocation3], 4294966272 }
  0x2f   :  { %2304 = dma.done.wait [#allocation6], 4352  }
  0x30   :  { %2305 = vsyncadd [#allocation6], 4294962944 }
  0x31   :  { %2306 = dma.done.wait [#allocation9], 528  }
  0x32   :  { %2307 = vsyncadd [#allocation9], 4294966768  ;;  %v2316_v0 = vmov 2   ;;  %v2317_v1 = vmov 0   ;;  %v67_v2 = vld [vmem:[#allocation5] sm:$0xff]  ;;  %v2318_v3 = vmov 3   ;;  %v121_v34 = vlaneseq }
  0x33   :  { %2179 = vset.pattern.permute.xlu1 %v2316_v0  ;;  %2177 = vset.pattern.permute.xlu0 %v2317_v1  ;;  %v2319_v4 = vmov 1   ;;  %v2320_v5 = vmov 4   ;;  %v2321_v6 = vmov 5   ;;  %v2322_v7 = vmov 6   ;;  %v101_v31 = vld [vmem:[#allocation2] sm:$0xff]  ;;  %s2325_s2 = smov [#allocation10]  }
  0x34   :  { %78 = vperm.xlu1 %2179, %v67_v2   ;;  %70 = vperm.xlu0 %2177, %v67_v2   ;;  %v2323_v8 = vmov 7   ;;  %v122_v35 = vshrl.u32 %v121_v34, 7  ;;  %vm716_vm0 = vcmask 64512   ;;  %s2102_s3 = sshll.u32 %s2325_s2, 4  ;;  %vm2062_vm1 = vcmask 850944   ;;  %s2103_s3 = int_to_ptr.vmem [resolvable:$true] %s2102_s3 }
  0x35   :  { %s2282_s10 = scalar_lea.vmem %s2103_s3, 8448  ;;  %p2287_p7 = scmp.lt.s32.totalorder %s2103_s3, %s2103_s3 }
  0x36   :  { %v2390_v36 = vsub.s32 0, %v122_v35  ;;  %v2392_v37 = vsub.s32 1, %v122_v35  ;;  %v2394_v38 = vsub.s32 2, %v122_v35  ;;  %v2396_v39 = vsub.s32 3, %v122_v35  ;;  %p2283_p6 = scmp.ne.s32.totalorder %s2103_s3, %s2282_s10  ;;  %p2288_p8 = scmp.lt.s32.totalorder %s2282_s10, %s2282_s10 }
  0x37   :  { %v2398_v40 = vsub.s32 4, %v122_v35  ;;  %v2400_v41 = vsub.s32 5, %v122_v35  ;;  %v2402_v42 = vsub.s32 6, %v122_v35  ;;  %v2404_v43 = vsub.s32 7, %v122_v35 }
  0x38   :  { %2180 = vset.pattern.permute.xlu1 %v2318_v3  ;;  %2178 = vset.pattern.permute.xlu0 %v2319_v4  ;;  %v120_v3 = vld [vmem:[#allocation2 + $0x8] sm:$0xff]  ;;  %p2289_p9 = por %p2288_p8, %p2287_p7 }
  0x39   :  { %82 = vperm.xlu1 %2180, %v67_v2   ;;  %74 = vperm.xlu0 %2178, %v67_v2  }
  0x3a   :  { %p2290_p10 = pnand %p2289_p9, %p2283_p6 }
  0x3d   :  { %2181 = vset.pattern.permute.xlu1 %v2320_v5  ;;  %2182 = vset.pattern.permute.xlu0 %v2321_v6 }
  0x3e   :  { %86 = vperm.xlu1 %2181, %v67_v2   ;;  %90 = vperm.xlu0 %2182, %v67_v2  }
  0x42   :  { %2183 = vset.pattern.permute.xlu1 %v2322_v7 }
  0x43   :  { %94 = vperm.xlu1 %2183, %v67_v2  }
  0x47   :  { %2184 = vset.pattern.permute.xlu1 %v2323_v8 }
  0x48   :  { %98 = vperm.xlu1 %2184, %v67_v2  }
  0xaf   :  { %v2366_v9 = vpop.permute.xlu1 %78  ;;  %v2368_v10 = vpop.permute.xlu0 %70 }
  0xb0   :  { %v102_v16 = vmul.f32 0.0, %v2368_v10  ;;  %v104_v19 = vmul.f32 0.0, %v2366_v9 }
  0xb4   :  { %v2370_v11 = vpop.permute.xlu1 %82  ;;  %v2372_v12 = vpop.permute.xlu0 %74 }
  0xb5   :  { %v105_v17 = vmul.f32 0.0, %v2370_v11  ;;  %v103_v18 = vmul.f32 0.0, %v2372_v12 }
  0xb7   :  { %v111_v23 = vadd.f32 %v105_v17, %v104_v19  ;;  %v110_v24 = vadd.f32 %v103_v18, %v102_v16 }
  0xb9   :  { %v2374_v13 = vpop.permute.xlu1 %86  ;;  %v2378_v15 = vpop.permute.xlu0 %90  ;;  %v114_v29 = vadd.f32 %v111_v23, %v110_v24 }
  0xba   :  { %v106_v20 = vmul.f32 0.0, %v2374_v13  ;;  %v107_v21 = vmul.f32 0.0, %v2378_v15 }
  0xbc   :  { %v112_v27 = vadd.f32 %v107_v21, %v106_v20 }
  0xbe   :  { %v2376_v14 = vpop.permute.xlu1 %94 }
  0xbf   :  { %v108_v25 = vmul.f32 0.0, %v2376_v14 }
  0xc3   :  { %v2386_v22 = vpop.permute.xlu1 %98 }
  0xc4   :  { %v109_v26 = vmul.f32 0.0, %v2386_v22 }
  0xc6   :  { %v113_v28 = vadd.f32 %v109_v26, %v108_v25 }
  0xc8   :  { %v115_v30 = vadd.f32 %v113_v28, %v112_v27 }
  0xca   :  { %v116_v32 = vadd.f32 %v115_v30, %v114_v29 }
  0xcc   :  { %v117_v33 = vadd.f32 %v116_v32, %v101_v31 }
  0xce   :  { %2186 = vtanh.f32 %v117_v33 }
  0xdb   :  { %v2187_v44 = vpop.eup %2186 }
  0xdc   :  { %v124_v45 = vrot.slane %v2187_v44, %v2390_v36  ;;  %v129_v46 = vrot.slane %v2187_v44, %v2392_v37  ;;  %v134_v47 = vrot.slane %v2187_v44, %v2394_v38  ;;  %v139_v48 = vrot.slane %v2187_v44, %v2396_v39 }
  0xdd   :  { %v144_v49 = vrot.slane %v2187_v44, %v2398_v40  ;;  %v149_v50 = vrot.slane %v2187_v44, %v2400_v41  ;;  %v154_v51 = vrot.slane %v2187_v44, %v2402_v42  ;;  %v159_v52 = vrot.slane %v2187_v44, %v2404_v43 }
  0xde   :  { %v125_v53 = vmul.f32 %v124_v45, %v2368_v10  ;;  %v130_v54 = vmul.f32 %v129_v46, %v2372_v12  ;;  %v135_v55 = vmul.f32 %v134_v47, %v2366_v9  ;;  %v140_v56 = vmul.f32 %v139_v48, %v2370_v11  ;;  %v171_v46 = vld [vmem:[#allocation2 + $0x10] sm:$0xff] }
  0xdf   :  { %v145_v57 = vmul.f32 %v144_v49, %v2374_v13  ;;  %v150_v58 = vmul.f32 %v149_v50, %v2378_v15  ;;  %v155_v59 = vmul.f32 %v154_v51, %v2376_v14  ;;  %v160_v60 = vmul.f32 %v159_v52, %v2386_v22 }
  0xe0   :  { %v161_v61 = vadd.f32 %v130_v54, %v125_v53  ;;  %v162_v62 = vadd.f32 %v140_v56, %v135_v55 }
  0xe1   :  { %v163_v63 = vadd.f32 %v150_v58, %v145_v57  ;;  %v164_v0 = vadd.f32 %v160_v60, %v155_v59 }
  0xe2   :  { %v165_v1 = vadd.f32 %v162_v62, %v161_v61 }
  0xe3   :  { %v166_v2 = vadd.f32 %v164_v0, %v163_v63 }
  0xe5   :  { %v167_v4 = vadd.f32 %v166_v2, %v165_v1 }
  0xe7   :  { %v168_v5 = vadd.f32 %v167_v4, %v120_v3 }
  0xe9   :  { %2188 = vtanh.f32 %v168_v5 }
  0xf6   :  { %v2189_v6 = vpop.eup %2188 }
  0xf7   :  { %v175_v7 = vrot.slane %v2189_v6, %v2390_v36  ;;  %v180_v16 = vrot.slane %v2189_v6, %v2392_v37  ;;  %v185_v17 = vrot.slane %v2189_v6, %v2394_v38  ;;  %v190_v18 = vrot.slane %v2189_v6, %v2396_v39 }
  0xf8   :  { %v195_v19 = vrot.slane %v2189_v6, %v2398_v40  ;;  %v200_v20 = vrot.slane %v2189_v6, %v2400_v41  ;;  %v205_v21 = vrot.slane %v2189_v6, %v2402_v42  ;;  %v210_v23 = vrot.slane %v2189_v6, %v2404_v43 }
  0xf9   :  { %v176_v24 = vmul.f32 %v175_v7, %v2368_v10  ;;  %v181_v25 = vmul.f32 %v180_v16, %v2372_v12  ;;  %v186_v26 = vmul.f32 %v185_v17, %v2366_v9  ;;  %v191_v27 = vmul.f32 %v190_v18, %v2370_v11  ;;  %v477_v16 = vld [vmem:[#allocation7 + $0x8] sm:$0xff]  ;;  %v476_v17 = vld [vmem:[#allocation7] sm:$0xff]  ;;  %v479_v18 = vld [vmem:[#allocation7 + $0x18] sm:$0xff] }
  0xfa   :  { %v196_v28 = vmul.f32 %v195_v19, %v2374_v13  ;;  %v201_v29 = vmul.f32 %v200_v20, %v2378_v15  ;;  %v206_v30 = vmul.f32 %v205_v21, %v2376_v14  ;;  %v211_v31 = vmul.f32 %v210_v23, %v2386_v22  ;;  %v222_v19 = vld [vmem:[#allocation2 + $0x18] sm:$0xff]  ;;  %753 = vmatprep.subr.mxu0 %v477_v16  ;;  %v481_v21 = vld [vmem:[#allocation7 + $0x28] sm:$0xff] }
  0xfb   :  { %v212_v32 = vadd.f32 %v181_v25, %v176_v24  ;;  %v213_v33 = vadd.f32 %v191_v27, %v186_v26  ;;  %830 = vmatprep.subr.mxu1 %v479_v18  ;;  %v478_v20 = vld [vmem:[#allocation7 + $0x10] sm:$0xff]  ;;  %754 = vmatpush1.msra.mxu0 %v476_v17  ;;  %v2324_v24 = vmov 0.0  }
  0xfc   :  { %v214_v34 = vadd.f32 %v201_v29, %v196_v28  ;;  %v215_v35 = vadd.f32 %v211_v31, %v206_v30  ;;  %787 = vmatprep.mubr.f32.mxu0 %v2324_v24  ;;  %831 = vmatpush1.msra.mxu1 %v478_v20 }
  0xfd   :  { %v216_v44 = vadd.f32 %v213_v33, %v212_v32  ;;  %864 = vmatprep.mubr.f32.mxu1 %v2324_v24  ;;  %907 = vmatprep.subr.mxu0 %v481_v21 }
  0xfe   :  { %v217_v45 = vadd.f32 %v215_v35, %v214_v34 }
 0x100   :  { %v218_v47 = vadd.f32 %v217_v45, %v216_v44 }
 0x102   :  { %v219_v48 = vadd.f32 %v218_v47, %v171_v46 }
 0x104   :  { %2190 = vtanh.f32 %v219_v48 }
 0x111   :  { %v2191_v49 = vpop.eup %2190 }
 0x112   :  { %v226_v50 = vrot.slane %v2191_v49, %v2390_v36  ;;  %v231_v51 = vrot.slane %v2191_v49, %v2392_v37  ;;  %v236_v52 = vrot.slane %v2191_v49, %v2394_v38  ;;  %v241_v53 = vrot.slane %v2191_v49, %v2396_v39 }
 0x113   :  { %v246_v54 = vrot.slane %v2191_v49, %v2398_v40  ;;  %v251_v55 = vrot.slane %v2191_v49, %v2400_v41  ;;  %v256_v56 = vrot.slane %v2191_v49, %v2402_v42  ;;  %v261_v57 = vrot.slane %v2191_v49, %v2404_v43 }
 0x114   :  { %v227_v58 = vmul.f32 %v226_v50, %v2368_v10  ;;  %v232_v59 = vmul.f32 %v231_v51, %v2372_v12  ;;  %v237_v60 = vmul.f32 %v236_v52, %v2366_v9  ;;  %v242_v61 = vmul.f32 %v241_v53, %v2370_v11 }
 0x115   :  { %v247_v62 = vmul.f32 %v246_v54, %v2374_v13  ;;  %v252_v63 = vmul.f32 %v251_v55, %v2378_v15  ;;  %v257_v0 = vmul.f32 %v256_v56, %v2376_v14  ;;  %v262_v1 = vmul.f32 %v261_v57, %v2386_v22  ;;  %v273_v57 = vld [vmem:[#allocation2 + $0x20] sm:$0xff] }
 0x116   :  { %v263_v2 = vadd.f32 %v232_v59, %v227_v58  ;;  %v264_v3 = vadd.f32 %v242_v61, %v237_v60 }
 0x117   :  { %v265_v4 = vadd.f32 %v252_v63, %v247_v62  ;;  %v266_v5 = vadd.f32 %v262_v1, %v257_v0 }
 0x118   :  { %v267_v6 = vadd.f32 %v264_v3, %v263_v2 }
 0x119   :  { %v268_v7 = vadd.f32 %v266_v5, %v265_v4 }
 0x11b   :  { %v269_v23 = vadd.f32 %v268_v7, %v267_v6 }
 0x11d   :  { %v270_v25 = vadd.f32 %v269_v23, %v222_v19 }
 0x11f   :  { %2192 = vtanh.f32 %v270_v25 }
 0x12c   :  { %v2193_v26 = vpop.eup %2192 }
 0x12d   :  { %v277_v27 = vrot.slane %v2193_v26, %v2390_v36  ;;  %v282_v28 = vrot.slane %v2193_v26, %v2392_v37  ;;  %v287_v29 = vrot.slane %v2193_v26, %v2394_v38  ;;  %v292_v30 = vrot.slane %v2193_v26, %v2396_v39 }
 0x12e   :  { %v297_v31 = vrot.slane %v2193_v26, %v2398_v40  ;;  %v302_v32 = vrot.slane %v2193_v26, %v2400_v41  ;;  %v307_v33 = vrot.slane %v2193_v26, %v2402_v42  ;;  %v312_v34 = vrot.slane %v2193_v26, %v2404_v43 }
 0x12f   :  { %v278_v35 = vmul.f32 %v277_v27, %v2368_v10  ;;  %v283_v44 = vmul.f32 %v282_v28, %v2372_v12  ;;  %v288_v45 = vmul.f32 %v287_v29, %v2366_v9  ;;  %v293_v46 = vmul.f32 %v292_v30, %v2370_v11  ;;  %v324_v29 = vld [vmem:[#allocation2 + $0x28] sm:$0xff] }
 0x130   :  { %v298_v47 = vmul.f32 %v297_v31, %v2374_v13  ;;  %v303_v48 = vmul.f32 %v302_v32, %v2378_v15  ;;  %v308_v49 = vmul.f32 %v307_v33, %v2376_v14  ;;  %v313_v50 = vmul.f32 %v312_v34, %v2386_v22 }
 0x131   :  { %v314_v51 = vadd.f32 %v283_v44, %v278_v35  ;;  %v315_v52 = vadd.f32 %v293_v46, %v288_v45 }
 0x132   :  { %v316_v53 = vadd.f32 %v303_v48, %v298_v47  ;;  %v317_v54 = vadd.f32 %v313_v50, %v308_v49 }
 0x133   :  { %v318_v55 = vadd.f32 %v315_v52, %v314_v51 }
 0x134   :  { %v319_v56 = vadd.f32 %v317_v54, %v316_v53 }
 0x136   :  { %v320_v58 = vadd.f32 %v319_v56, %v318_v55 }
 0x138   :  { %v321_v59 = vadd.f32 %v320_v58, %v273_v57 }
 0x13a   :  { %2194 = vtanh.f32 %v321_v59 }
 0x147   :  { %v2195_v60 = vpop.eup %2194 }
 0x148   :  { %v328_v61 = vrot.slane %v2195_v60, %v2390_v36  ;;  %v333_v62 = vrot.slane %v2195_v60, %v2392_v37  ;;  %v338_v63 = vrot.slane %v2195_v60, %v2394_v38  ;;  %v343_v0 = vrot.slane %v2195_v60, %v2396_v39 }
 0x149   :  { %v348_v1 = vrot.slane %v2195_v60, %v2398_v40  ;;  %v353_v2 = vrot.slane %v2195_v60, %v2400_v41  ;;  %v358_v3 = vrot.slane %v2195_v60, %v2402_v42  ;;  %v363_v4 = vrot.slane %v2195_v60, %v2404_v43 }
 0x14a   :  { %v329_v5 = vmul.f32 %v328_v61, %v2368_v10  ;;  %v334_v6 = vmul.f32 %v333_v62, %v2372_v12  ;;  %v339_v7 = vmul.f32 %v338_v63, %v2366_v9  ;;  %v344_v16 = vmul.f32 %v343_v0, %v2370_v11  ;;  %v375_v63 = vld [vmem:[#allocation2 + $0x30] sm:$0xff] }
 0x14b   :  { %v349_v17 = vmul.f32 %v348_v1, %v2374_v13  ;;  %v354_v18 = vmul.f32 %v353_v2, %v2378_v15  ;;  %v359_v19 = vmul.f32 %v358_v3, %v2376_v14  ;;  %v364_v20 = vmul.f32 %v363_v4, %v2386_v22 }
 0x14c   :  { %v365_v21 = vadd.f32 %v334_v6, %v329_v5  ;;  %v366_v23 = vadd.f32 %v344_v16, %v339_v7 }
 0x14d   :  { %v367_v25 = vadd.f32 %v354_v18, %v349_v17  ;;  %v368_v26 = vadd.f32 %v364_v20, %v359_v19 }
 0x14e   :  { %v369_v27 = vadd.f32 %v366_v23, %v365_v21 }
 0x14f   :  { %v370_v28 = vadd.f32 %v368_v26, %v367_v25 }
 0x151   :  { %v371_v30 = vadd.f32 %v370_v28, %v369_v27 }
 0x153   :  { %v372_v31 = vadd.f32 %v371_v30, %v324_v29 }
 0x155   :  { %2196 = vtanh.f32 %v372_v31 }
 0x162   :  { %v2197_v32 = vpop.eup %2196 }
 0x163   :  { %v379_v33 = vrot.slane %v2197_v32, %v2390_v36  ;;  %v384_v34 = vrot.slane %v2197_v32, %v2392_v37  ;;  %v389_v35 = vrot.slane %v2197_v32, %v2394_v38  ;;  %v394_v44 = vrot.slane %v2197_v32, %v2396_v39 }
 0x164   :  { %v399_v45 = vrot.slane %v2197_v32, %v2398_v40  ;;  %v404_v46 = vrot.slane %v2197_v32, %v2400_v41  ;;  %v409_v47 = vrot.slane %v2197_v32, %v2402_v42  ;;  %v414_v48 = vrot.slane %v2197_v32, %v2404_v43 }
 0x165   :  { %v380_v49 = vmul.f32 %v379_v33, %v2368_v10  ;;  %v385_v50 = vmul.f32 %v384_v34, %v2372_v12  ;;  %v390_v51 = vmul.f32 %v389_v35, %v2366_v9  ;;  %v395_v52 = vmul.f32 %v394_v44, %v2370_v11  ;;  %v426_v34 = vld [vmem:[#allocation2 + $0x38] sm:$0xff]  ;;  %v487_v44 = vld [vmem:[#allocation7 + $0x58] sm:$0xff] }
 0x166   :  { %v400_v53 = vmul.f32 %v399_v45, %v2374_v13  ;;  %v405_v54 = vmul.f32 %v404_v46, %v2378_v15  ;;  %v410_v55 = vmul.f32 %v409_v47, %v2376_v14  ;;  %v415_v56 = vmul.f32 %v414_v48, %v2386_v22  ;;  %v484_v45 = vld [vmem:[#allocation7 + $0x40] sm:$0xff]  ;;  %v486_v46 = vld [vmem:[#allocation7 + $0x50] sm:$0xff]  ;;  %v489_v47 = vld [vmem:[#allocation7 + $0x68] sm:$0xff] }
 0x167   :  { %v416_v57 = vadd.f32 %v385_v50, %v380_v49  ;;  %v417_v58 = vadd.f32 %v395_v52, %v390_v51  ;;  %v491_v48 = vld [vmem:[#allocation7 + $0x78] sm:$0xff]  ;;  %v488_v49 = vld [vmem:[#allocation7 + $0x60] sm:$0xff]  ;;  %v490_v50 = vld [vmem:[#allocation7 + $0x70] sm:$0xff] }
 0x168   :  { %v418_v59 = vadd.f32 %v405_v54, %v400_v53  ;;  %v419_v60 = vadd.f32 %v415_v56, %v410_v55  ;;  %v493_v51 = vld [vmem:[#allocation7 + $0x88] sm:$0xff]  ;;  %v495_v52 = vld [vmem:[#allocation7 + $0x98] sm:$0xff]  ;;  %v492_v53 = vld [vmem:[#allocation7 + $0x80] sm:$0xff] }
 0x169   :  { %v420_v61 = vadd.f32 %v417_v58, %v416_v57  ;;  %v494_v54 = vld [vmem:[#allocation7 + $0x90] sm:$0xff]  ;;  %v497_v55 = vld [vmem:[#allocation7 + $0xa8] sm:$0xff]  ;;  %v499_v56 = vld [vmem:[#allocation7 + $0xb8] sm:$0xff] }
 0x16a   :  { %v421_v62 = vadd.f32 %v419_v60, %v418_v59  ;;  %v496_v57 = vld [vmem:[#allocation7 + $0xa0] sm:$0xff]  ;;  %v498_v58 = vld [vmem:[#allocation7 + $0xb0] sm:$0xff]  ;;  %v501_v59 = vld [vmem:[#allocation7 + $0xc8] sm:$0xff] }
 0x16b   :  { %v503_v60 = vld [vmem:[#allocation7 + $0xd8] sm:$0xff] }
 0x16c   :  { %v422_v0 = vadd.f32 %v421_v62, %v420_v61  ;;  %v500_v61 = vld [vmem:[#allocation7 + $0xc0] sm:$0xff]  ;;  %v502_v62 = vld [vmem:[#allocation7 + $0xd0] sm:$0xff] }
 0x16e   :  { %v423_v1 = vadd.f32 %v422_v0, %v375_v63  ;;  %v505_v63 = vld [vmem:[#allocation7 + $0xe8] sm:$0xff]  ;;  %v507_v0 = vld [vmem:[#allocation7 + $0xf8] sm:$0xff] }
 0x170   :  { %2198 = vtanh.f32 %v423_v1  ;;  %v504_v1 = vld [vmem:[#allocation7 + $0xe0] sm:$0xff] }
 0x17d   :  { %v2199_v2 = vpop.eup %2198 }
 0x17e   :  { %v430_v3 = vrot.slane %v2199_v2, %v2390_v36  ;;  %v435_v4 = vrot.slane %v2199_v2, %v2392_v37  ;;  %v440_v5 = vrot.slane %v2199_v2, %v2394_v38  ;;  %v445_v6 = vrot.slane %v2199_v2, %v2396_v39 }
 0x17f   :  { %v450_v7 = vrot.slane %v2199_v2, %v2398_v40  ;;  %v455_v16 = vrot.slane %v2199_v2, %v2400_v41  ;;  %v460_v17 = vrot.slane %v2199_v2, %v2402_v42  ;;  %v465_v18 = vrot.slane %v2199_v2, %v2404_v43  ;;  %v506_v2 = vld [vmem:[#allocation7 + $0xf0] sm:$0xff] }
 0x180   :  { %v431_v19 = vmul.f32 %v430_v3, %v2368_v10  ;;  %v436_v20 = vmul.f32 %v435_v4, %v2372_v12  ;;  %v441_v21 = vmul.f32 %v440_v5, %v2366_v9  ;;  %v446_v23 = vmul.f32 %v445_v6, %v2370_v11  ;;  %v483_v11 = vld [vmem:[#allocation7 + $0x38] sm:$0xff]  ;;  %v508_v3 = vld [vmem:[#allocation7 + $0x100] sm:$0xff]  ;;  %v509_v4 = vld [vmem:[#allocation8] sm:$0xff] }
 0x181   :  { %v451_v25 = vmul.f32 %v450_v7, %v2374_v13  ;;  %v456_v26 = vmul.f32 %v455_v16, %v2378_v15  ;;  %v461_v27 = vmul.f32 %v460_v17, %v2376_v14  ;;  %v466_v28 = vmul.f32 %v465_v18, %v2386_v22  ;;  %984 = vmatprep.subr.mxu1 %v483_v11  ;;  %v480_v13 = vld [vmem:[#allocation7 + $0x20] sm:$0xff]  ;;  %v482_v15 = vld [vmem:[#allocation7 + $0x30] sm:$0xff]  ;;  %v485_v22 = vld [vmem:[#allocation7 + $0x48] sm:$0xff] }
 0x182   :  { %v467_v29 = vadd.f32 %v436_v20, %v431_v19  ;;  %v468_v30 = vadd.f32 %v446_v23, %v441_v21  ;;  %v522_v5 = vrot.slane %v509_v4, %v2390_v36  ;;  %v530_v6 = vrot.slane %v509_v4, %v2394_v38 }
 0x183   :  { %v469_v31 = vadd.f32 %v456_v26, %v451_v25  ;;  %v470_v32 = vadd.f32 %v466_v28, %v461_v27  ;;  %v526_v7 = vrot.slane %v509_v4, %v2392_v37 }
 0x184   :  { %v471_v33 = vadd.f32 %v468_v30, %v467_v29  ;;  %v538_v30 = vrot.slane %v509_v4, %v2398_v40 }
 0x185   :  { %v472_v10 = vadd.f32 %v470_v32, %v469_v31  ;;  %v546_v31 = vrot.slane %v509_v4, %v2402_v42 }
 0x187   :  { %v473_v12 = vadd.f32 %v472_v10, %v471_v33 }
 0x189   :  { %v474_v35 = vadd.f32 %v473_v12, %v426_v34  ;;  %v542_v12 = vrot.slane %v509_v4, %v2400_v41 }
 0x18b   :  { %2200 = vtanh.f32 %v474_v35  ;;  %v550_v35 = vrot.slane %v509_v4, %v2404_v43 }
 0x198   :  { %v2201_v9 = vpop.eup %2200 }
 0x199   :  { %684 = vxpose.xlu0.b32.start.end [1/1] (short) (narrow) %v2201_v9, 16 }
 0x1c2   :  { %2185 = vset.pattern.permute.xlu0 %v2323_v8 }
 0x215   :  { %v2521_v14 = vpop.trf.xlu0 }
 0x216   :  { %2117 = vmatmul.mubr.msk.f32.vlgmr.msra.gmra.mxu0 %vm716_vm0, %v2521_v14  ;;  %2119 = vmatmul.mubr.msk.f32.vlgmr.msra.gmra.mxu1 %vm716_vm0, %v2521_v14 }
 0x217   :  { %908 = vmatpush1.msra.mxu0 %v480_v13  ;;  %793 = vmatprep.mubr.f32.mxu0 %v2324_v24 }
 0x218   :  { %870 = vmatprep.mubr.f32.mxu1 %v2324_v24  ;;  %985 = vmatpush1.msra.mxu1 %v482_v15 }
 0x219   :  { %v2529_v8 = vpop.trf.xlu0  ;;  %1061 = vmatprep.subr.mxu0 %v485_v22  ;;  %1138 = vmatprep.subr.mxu1 %v487_v44  ;;  %v510_v44 = vld [vmem:[#allocation8 + $0x8] sm:$0xff] }
 0x21a   :  { %2118 = vmatmul.mubr.msk.f32.gmra.mxu0 %vm716_vm0, %v2529_v8  ;;  %2120 = vmatmul.mubr.msk.f32.gmra.mxu1 %vm716_vm0, %v2529_v8 }
 0x21b   :  { %941 = vmatprep.mubr.f32.mxu0 %v2324_v24  ;;  %1018 = vmatprep.mubr.f32.mxu1 %v2324_v24 }
 0x21e   :  { %2121 = vmatmul.mubr.msk.f32.vlgmr.msra.gmra.mxu0 %vm716_vm0, %v2521_v14  ;;  %2123 = vmatmul.mubr.msk.f32.vlgmr.msra.gmra.mxu1 %vm716_vm0, %v2521_v14 }
 0x21f   :  { %1062 = vmatpush1.msra.mxu0 %v484_v45  ;;  %947 = vmatprep.mubr.f32.mxu0 %v2324_v24 }
 0x220   :  { %1024 = vmatprep.mubr.f32.mxu1 %v2324_v24  ;;  %1139 = vmatpush1.msra.mxu1 %v486_v46 }
 0x221   :  { %1215 = vmatprep.subr.mxu0 %v489_v47  ;;  %1292 = vmatprep.subr.mxu1 %v491_v48 }
 0x222   :  { %2122 = vmatmul.mubr.msk.f32.gmra.mxu0 %vm716_vm0, %v2529_v8  ;;  %2124 = vmatmul.mubr.msk.f32.gmra.mxu1 %vm716_vm0, %v2529_v8 }
 0x223   :  { %1095 = vmatprep.mubr.f32.mxu0 %v2324_v24  ;;  %1172 = vmatprep.mubr.f32.mxu1 %v2324_v24 }
 0x226   :  { %2125 = vmatmul.mubr.msk.f32.vlgmr.msra.gmra.mxu0 %vm716_vm0, %v2521_v14  ;;  %2127 = vmatmul.mubr.msk.f32.vlgmr.msra.gmra.mxu1 %vm716_vm0, %v2521_v14 }
 0x227   :  { %1216 = vmatpush1.msra.mxu0 %v488_v49  ;;  %1101 = vmatprep.mubr.f32.mxu0 %v2324_v24 }
 0x228   :  { %1178 = vmatprep.mubr.f32.mxu1 %v2324_v24  ;;  %1293 = vmatpush1.msra.mxu1 %v490_v50  ;;  %v554_v50 = vrot.slane %v510_v44, %v2390_v36 }
 0x229   :  { %1369 = vmatprep.subr.mxu0 %v493_v51  ;;  %1446 = vmatprep.subr.mxu1 %v495_v52  ;;  %v562_v51 = vrot.slane %v510_v44, %v2394_v38 }
 0x22a   :  { %2126 = vmatmul.mubr.msk.f32.gmra.mxu0 %vm716_vm0, %v2529_v8  ;;  %2128 = vmatmul.mubr.msk.f32.gmra.mxu1 %vm716_vm0, %v2529_v8 }
 0x22b   :  { %1249 = vmatprep.mubr.f32.mxu0 %v2324_v24  ;;  %1326 = vmatprep.mubr.f32.mxu1 %v2324_v24 }
 0x22e   :  { %2129 = vmatmul.mubr.msk.f32.vlgmr.msra.gmra.mxu0 %vm716_vm0, %v2521_v14  ;;  %2131 = vmatmul.mubr.msk.f32.vlgmr.msra.gmra.mxu1 %vm716_vm0, %v2521_v14 }
 0x22f   :  { %1370 = vmatpush1.msra.mxu0 %v492_v53  ;;  %1255 = vmatprep.mubr.f32.mxu0 %v2324_v24 }
 0x230   :  { %1332 = vmatprep.mubr.f32.mxu1 %v2324_v24  ;;  %1447 = vmatpush1.msra.mxu1 %v494_v54 }
 0x231   :  { %1523 = vmatprep.subr.mxu0 %v497_v55  ;;  %1600 = vmatprep.subr.mxu1 %v499_v56  ;;  %v558_v56 = vrot.slane %v510_v44, %v2392_v37 }
 0x232   :  { %2130 = vmatmul.mubr.msk.f32.gmra.mxu0 %vm716_vm0, %v2529_v8  ;;  %2132 = vmatmul.mubr.msk.f32.gmra.mxu1 %vm716_vm0, %v2529_v8 }
 0x233   :  { %1403 = vmatprep.mubr.f32.mxu0 %v2324_v24  ;;  %1480 = vmatprep.mubr.f32.mxu1 %v2324_v24 }
 0x236   :  { %2133 = vmatmul.mubr.msk.f32.vlgmr.msra.gmra.mxu0 %vm716_vm0, %v2521_v14  ;;  %2135 = vmatmul.mubr.msk.f32.vlgmr.msra.gmra.mxu1 %vm716_vm0, %v2521_v14 }
 0x237   :  { %1524 = vmatpush1.msra.mxu0 %v496_v57  ;;  %1409 = vmatprep.mubr.f32.mxu0 %v2324_v24  ;;  %v566_v57 = vrot.slane %v510_v44, %v2396_v39 }
 0x238   :  { %1486 = vmatprep.mubr.f32.mxu1 %v2324_v24  ;;  %1601 = vmatpush1.msra.mxu1 %v498_v58 }
 0x239   :  { %1677 = vmatprep.subr.mxu0 %v501_v59  ;;  %1754 = vmatprep.subr.mxu1 %v503_v60 }
 0x23a   :  { %2134 = vmatmul.mubr.msk.f32.gmra.mxu0 %vm716_vm0, %v2529_v8  ;;  %2136 = vmatmul.mubr.msk.f32.gmra.mxu1 %vm716_vm0, %v2529_v8 }
 0x23b   :  { %1557 = vmatprep.mubr.f32.mxu0 %v2324_v24  ;;  %1634 = vmatprep.mubr.f32.mxu1 %v2324_v24 }
 0x23e   :  { %2137 = vmatmul.mubr.msk.f32.vlgmr.msra.gmra.mxu0 %vm716_vm0, %v2521_v14  ;;  %2139 = vmatmul.mubr.msk.f32.vlgmr.msra.gmra.mxu1 %vm716_vm0, %v2521_v14 }
 0x23f   :  { %1678 = vmatpush1.msra.mxu0 %v500_v61  ;;  %1563 = vmatprep.mubr.f32.mxu0 %v2324_v24 }
 0x240   :  { %1640 = vmatprep.mubr.f32.mxu1 %v2324_v24  ;;  %1755 = vmatpush1.msra.mxu1 %v502_v62 }
 0x241   :  { %1831 = vmatprep.subr.mxu0 %v505_v63  ;;  %1908 = vmatprep.subr.mxu1 %v507_v0 }
 0x242   :  { %2138 = vmatmul.mubr.msk.f32.gmra.mxu0 %vm716_vm0, %v2529_v8  ;;  %2140 = vmatmul.mubr.msk.f32.gmra.mxu1 %vm716_vm0, %v2529_v8 }
 0x243   :  { %1711 = vmatprep.mubr.f32.mxu0 %v2324_v24  ;;  %1788 = vmatprep.mubr.f32.mxu1 %v2324_v24 }
 0x246   :  { %2141 = vmatmul.mubr.msk.f32.vlgmr.msra.gmra.mxu0 %vm716_vm0, %v2521_v14  ;;  %2143 = vmatmul.mubr.msk.f32.vlgmr.msra.gmra.mxu1 %vm716_vm0, %v2521_v14 }
 0x247   :  { %1832 = vmatpush1.msra.mxu0 %v504_v1  ;;  %1717 = vmatprep.mubr.f32.mxu0 %v2324_v24 }
 0x248   :  { %1794 = vmatprep.mubr.f32.mxu1 %v2324_v24  ;;  %1909 = vmatpush1.msra.mxu1 %v506_v2 }
 0x249   :  { %2154 = vmatprep.subr.mxu0 %v508_v3 }
 0x24a   :  { %2142 = vmatmul.mubr.msk.f32.gmra.mxu0 %vm716_vm0, %v2529_v8  ;;  %2144 = vmatmul.mubr.msk.f32.gmra.mxu1 %vm716_vm0, %v2529_v8 }
 0x24b   :  { %1865 = vmatprep.mubr.f32.mxu0 %v2324_v24  ;;  %1942 = vmatprep.mubr.f32.mxu1 %v2324_v24 }
 0x24e   :  { %2145 = vmatmul.mubr.msk.f32.vlgmr.msra.gmra.mxu0 %vm716_vm0, %v2521_v14  ;;  %2147 = vmatmul.mubr.msk.f32.vlgmr.msra.gmra.mxu1 %vm716_vm0, %v2521_v14 }
 0x24f   :  { %2155 = vmatpush3.msra.mxu0 %v508_v3  ;;  %1871 = vmatprep.mubr.f32.mxu0 %v2324_v24 }
 0x250   :  { %1948 = vmatprep.mubr.f32.mxu1 %v2324_v24  ;;  %v534_v24 = vrot.slane %v509_v4, %v2396_v39 }
 0x252   :  { %2146 = vmatmul.mubr.msk.f32.gmra.mxu0 %vm716_vm0, %v2529_v8  ;;  %2148 = vmatmul.mubr.msk.f32.gmra.mxu1 %vm716_vm0, %v2529_v8 }
 0x253   :  { %2156 = vmatprep.mubr.msk.f32.mxu0 %vm716_vm0, %v2521_v14 }
 0x256   :  { %2157 = vmatmul.mubr.msk.f32.vlgmr.msra.gmra.mxu0 %vm716_vm0, %v2529_v8 }
 0x2d6   :  { %v789_v16 = vpop.f32.mrf.mxu0  ;;  %v866_v17 = vpop.f32.mrf.mxu1 }
 0x2d7   :  { %v790_v18 = vadd.f32 %v789_v16, %v522_v5  ;;  %v867_v19 = vadd.f32 %v866_v17, %v530_v6 }
 0x2d8   :  { %v791_v20 = vpop.f32.mrf.mxu0  ;;  %v868_v21 = vpop.f32.mrf.mxu1 }
 0x2d9   :  { %2030 = vst [vmem:[#allocation10] sm:$0xff] %v790_v18  ;;  %2032 = vst [vmem:[#allocation10 + $0x10] sm:$0xff] %v867_v19  ;;  %v792_v23 = vadd.f32 %v791_v20, %v526_v7  ;;  %v869_v25 = vadd.f32 %v868_v21, %v534_v24  ;;  %v574_v19 = vrot.slane %v510_v44, %v2400_v41 }
 0x2da   :  { %v795_v26 = vpop.f32.mrf.mxu0  ;;  %v872_v27 = vpop.f32.mrf.mxu1  ;;  %v582_v20 = vrot.slane %v510_v44, %v2404_v43 }
 0x2db   :  { %2031 = vst [vmem:[#allocation10 + $0x8] sm:$0xff] %v792_v23  ;;  %2033 = vst [vmem:[#allocation10 + $0x18] sm:$0xff] %v869_v25  ;;  %v796_v28 = vadd.f32 %v795_v26, %v522_v5  ;;  %v873_v29 = vadd.f32 %v872_v27, %v530_v6  ;;  %v570_v6 = vrot.slane %v510_v44, %v2398_v40 }
 0x2dc   :  { %v797_v32 = vpop.f32.mrf.mxu0  ;;  %v874_v33 = vpop.f32.mrf.mxu1 }
 0x2dd   :  { %2064 = vst [vmem:[#allocation10 + $0x108] sm:$0xff] %v796_v28  ;;  %2066 = vst [vmem:[#allocation10 + $0x118] sm:$0xff] %v873_v29  ;;  %v798_v10 = vadd.f32 %v797_v32, %v526_v7  ;;  %v875_v34 = vadd.f32 %v874_v33, %v534_v24  ;;  %v578_v7 = vrot.slane %v510_v44, %v2402_v42  ;;  %v511_v29 = vld [vmem:[#allocation8 + $0x10] sm:$0xff] }
 0x2de   :  { %v943_v9 = vpop.f32.mrf.mxu0  ;;  %v1020_v11 = vpop.f32.mrf.mxu1 }
 0x2df   :  { %2065 = vst [vmem:[#allocation10 + $0x110] sm:$0xff] %v798_v10  ;;  %2067 = vst [vmem:[#allocation10 + $0x120] sm:$0xff] %v875_v34  ;;  %v944_v13 = vadd.f32 %v943_v9, %v538_v30  ;;  %v1021_v14 = vadd.f32 %v1020_v11, %v546_v31 }
 0x2e0   :  { %v945_v15 = vpop.f32.mrf.mxu0  ;;  %v1022_v22 = vpop.f32.mrf.mxu1 }
 0x2e1   :  { %2034 = vst [vmem:[#allocation10 + $0x20] sm:$0xff] %v944_v13  ;;  %2036 = vst [vmem:[#allocation10 + $0x30] sm:$0xff] %v1021_v14  ;;  %v946_v8 = vadd.f32 %v945_v15, %v542_v12  ;;  %v1023_v45 = vadd.f32 %v1022_v22, %v550_v35  ;;  %v590_v15 = vrot.slane %v511_v29, %v2392_v37 }
 0x2e2   :  { %v949_v46 = vpop.f32.mrf.mxu0  ;;  %v1026_v47 = vpop.f32.mrf.mxu1  ;;  %v598_v22 = vrot.slane %v511_v29, %v2396_v39 }
 0x2e3   :  { %2035 = vst [vmem:[#allocation10 + $0x28] sm:$0xff] %v946_v8  ;;  %2037 = vst [vmem:[#allocation10 + $0x38] sm:$0xff] %v1023_v45  ;;  %v950_v48 = vadd.f32 %v949_v46, %v538_v30  ;;  %v1027_v49 = vadd.f32 %v1026_v47, %v546_v31 }
 0x2e4   :  { %v951_v52 = vpop.f32.mrf.mxu0  ;;  %v1028_v53 = vpop.f32.mrf.mxu1 }
 0x2e5   :  { %2068 = vst [vmem:[#allocation10 + $0x128] sm:$0xff] %v950_v48  ;;  %2070 = vst [vmem:[#allocation10 + $0x138] sm:$0xff] %v1027_v49  ;;  %v952_v54 = vadd.f32 %v951_v52, %v542_v12  ;;  %v1029_v55 = vadd.f32 %v1028_v53, %v550_v35  ;;  %v586_v12 = vrot.slane %v511_v29, %v2390_v36 }
 0x2e6   :  { %v1097_v58 = vpop.f32.mrf.mxu0  ;;  %v1174_v59 = vpop.f32.mrf.mxu1  ;;  %v594_v35 = vrot.slane %v511_v29, %v2394_v38 }
 0x2e7   :  { %2069 = vst [vmem:[#allocation10 + $0x130] sm:$0xff] %v952_v54  ;;  %2071 = vst [vmem:[#allocation10 + $0x140] sm:$0xff] %v1029_v55  ;;  %v1098_v60 = vadd.f32 %v1097_v58, %v554_v50  ;;  %v1175_v61 = vadd.f32 %v1174_v59, %v562_v51  ;;  %v602_v55 = vrot.slane %v511_v29, %v2398_v40 }
 0x2e8   :  { %v1099_v62 = vpop.f32.mrf.mxu0  ;;  %v1176_v63 = vpop.f32.mrf.mxu1 }
 0x2e9   :  { %2038 = vst [vmem:[#allocation10 + $0x40] sm:$0xff] %v1098_v60  ;;  %2040 = vst [vmem:[#allocation10 + $0x50] sm:$0xff] %v1175_v61  ;;  %v1100_v0 = vadd.f32 %v1099_v62, %v558_v56  ;;  %v1177_v1 = vadd.f32 %v1176_v63, %v566_v57  ;;  %v606_v61 = vrot.slane %v511_v29, %v2400_v41 }
 0x2ea   :  { %v1103_v2 = vpop.f32.mrf.mxu0  ;;  %v1180_v3 = vpop.f32.mrf.mxu1  ;;  %v614_v62 = vrot.slane %v511_v29, %v2404_v43 }
 0x2eb   :  { %2039 = vst [vmem:[#allocation10 + $0x48] sm:$0xff] %v1100_v0  ;;  %2041 = vst [vmem:[#allocation10 + $0x58] sm:$0xff] %v1177_v1  ;;  %v1104_v4 = vadd.f32 %v1103_v2, %v554_v50  ;;  %v1181_v5 = vadd.f32 %v1180_v3, %v562_v51 }
 0x2ec   :  { %v1105_v24 = vpop.f32.mrf.mxu0  ;;  %v1182_v16 = vpop.f32.mrf.mxu1 }
 0x2ed   :  { %2072 = vst [vmem:[#allocation10 + $0x148] sm:$0xff] %v1104_v4  ;;  %2074 = vst [vmem:[#allocation10 + $0x158] sm:$0xff] %v1181_v5  ;;  %v1106_v17 = vadd.f32 %v1105_v24, %v558_v56  ;;  %v1183_v18 = vadd.f32 %v1182_v16, %v566_v57  ;;  %v610_v56 = vrot.slane %v511_v29, %v2402_v42  ;;  %v512_v5 = vld [vmem:[#allocation8 + $0x18] sm:$0xff] }
 0x2ee   :  { %v1251_v21 = vpop.f32.mrf.mxu0  ;;  %v1328_v23 = vpop.f32.mrf.mxu1 }
 0x2ef   :  { %2073 = vst [vmem:[#allocation10 + $0x150] sm:$0xff] %v1106_v17  ;;  %2075 = vst [vmem:[#allocation10 + $0x160] sm:$0xff] %v1183_v18  ;;  %v1252_v25 = vadd.f32 %v1251_v21, %v570_v6  ;;  %v1329_v26 = vadd.f32 %v1328_v23, %v578_v7 }
 0x2f0   :  { %v1253_v27 = vpop.f32.mrf.mxu0  ;;  %v1330_v28 = vpop.f32.mrf.mxu1 }
 0x2f1   :  { %2042 = vst [vmem:[#allocation10 + $0x60] sm:$0xff] %v1252_v25  ;;  %2044 = vst [vmem:[#allocation10 + $0x70] sm:$0xff] %v1329_v26  ;;  %v1254_v30 = vadd.f32 %v1253_v27, %v574_v19  ;;  %v1331_v31 = vadd.f32 %v1330_v28, %v582_v20  ;;  %v622_v27 = vrot.slane %v512_v5, %v2392_v37 }
 0x2f2   :  { %v1257_v32 = vpop.f32.mrf.mxu0  ;;  %v1334_v33 = vpop.f32.mrf.mxu1  ;;  %v630_v28 = vrot.slane %v512_v5, %v2396_v39  ;;  %v634_v39 = vrot.slane %v512_v5, %v2398_v40 }
 0x2f3   :  { %2043 = vst [vmem:[#allocation10 + $0x68] sm:$0xff] %v1254_v30  ;;  %2045 = vst [vmem:[#allocation10 + $0x78] sm:$0xff] %v1331_v31  ;;  %v1258_v10 = vadd.f32 %v1257_v32, %v570_v6  ;;  %v1335_v34 = vadd.f32 %v1334_v33, %v578_v7 }
 0x2f4   :  { %v1259_v9 = vpop.f32.mrf.mxu0  ;;  %v1336_v11 = vpop.f32.mrf.mxu1 }
 0x2f5   :  { %2076 = vst [vmem:[#allocation10 + $0x168] sm:$0xff] %v1258_v10  ;;  %2078 = vst [vmem:[#allocation10 + $0x178] sm:$0xff] %v1335_v34  ;;  %v1260_v13 = vadd.f32 %v1259_v9, %v574_v19  ;;  %v1337_v14 = vadd.f32 %v1336_v11, %v582_v20  ;;  %v618_v19 = vrot.slane %v512_v5, %v2390_v36 }
 0x2f6   :  { %v1405_v44 = vpop.f32.mrf.mxu0  ;;  %v1482_v8 = vpop.f32.mrf.mxu1  ;;  %v626_v20 = vrot.slane %v512_v5, %v2394_v38  ;;  %v642_v9 = vrot.slane %v512_v5, %v2402_v42 }
 0x2f7   :  { %2077 = vst [vmem:[#allocation10 + $0x170] sm:$0xff] %v1260_v13  ;;  %2079 = vst [vmem:[#allocation10 + $0x180] sm:$0xff] %v1337_v14  ;;  %v1406_v45 = vadd.f32 %v1405_v44, %v586_v12  ;;  %v1483_v46 = vadd.f32 %v1482_v8, %v594_v35  ;;  %v646_v44 = vrot.slane %v512_v5, %v2404_v43 }
 0x2f8   :  { %v1407_v47 = vpop.f32.mrf.mxu0  ;;  %v1484_v48 = vpop.f32.mrf.mxu1 }
 0x2f9   :  { %2046 = vst [vmem:[#allocation10 + $0x80] sm:$0xff] %v1406_v45  ;;  %2048 = vst [vmem:[#allocation10 + $0x90] sm:$0xff] %v1483_v46  ;;  %v1408_v49 = vadd.f32 %v1407_v47, %v590_v15  ;;  %v1485_v50 = vadd.f32 %v1484_v48, %v598_v22 }
 0x2fa   :  { %v1411_v51 = vpop.f32.mrf.mxu0  ;;  %v1488_v52 = vpop.f32.mrf.mxu1 }
 0x2fb   :  { %2047 = vst [vmem:[#allocation10 + $0x88] sm:$0xff] %v1408_v49  ;;  %2049 = vst [vmem:[#allocation10 + $0x98] sm:$0xff] %v1485_v50  ;;  %v1412_v53 = vadd.f32 %v1411_v51, %v586_v12  ;;  %v1489_v54 = vadd.f32 %v1488_v52, %v594_v35 }
 0x2fc   :  { %v1413_v57 = vpop.f32.mrf.mxu0  ;;  %v1490_v58 = vpop.f32.mrf.mxu1 }
 0x2fd   :  { %2080 = vst [vmem:[#allocation10 + $0x188] sm:$0xff] %v1412_v53  ;;  %2082 = vst [vmem:[#allocation10 + $0x198] sm:$0xff] %v1489_v54  ;;  %v1414_v59 = vadd.f32 %v1413_v57, %v590_v15  ;;  %v1491_v60 = vadd.f32 %v1490_v58, %v598_v22  ;;  %v638_v22 = vrot.slane %v512_v5, %v2400_v41  ;;  %v2116_v54 = vld [vmem:[#allocation8 + $0x20] ss:$0 sm:$0xff] }
 0x2fe   :  { %v1559_v63 = vpop.f32.mrf.mxu0  ;;  %v1636_v0 = vpop.f32.mrf.mxu1 }
 0x2ff   :  { %2081 = vst [vmem:[#allocation10 + $0x190] sm:$0xff] %v1414_v59  ;;  %2083 = vst [vmem:[#allocation10 + $0x1a0] sm:$0xff] %v1491_v60  ;;  %v1560_v1 = vadd.f32 %v1559_v63, %v602_v55  ;;  %v1637_v2 = vadd.f32 %v1636_v0, %v610_v56 }
 0x300   :  { %v1561_v3 = vpop.f32.mrf.mxu0  ;;  %v1638_v4 = vpop.f32.mrf.mxu1 }
 0x301   :  { %2050 = vst [vmem:[#allocation10 + $0xa0] sm:$0xff] %v1560_v1  ;;  %2052 = vst [vmem:[#allocation10 + $0xb0] sm:$0xff] %v1637_v2  ;;  %v1562_v6 = vadd.f32 %v1561_v3, %v606_v61  ;;  %v1639_v7 = vadd.f32 %v1638_v4, %v614_v62 }
 0x302   :  { %v1565_v24 = vpop.f32.mrf.mxu0  ;;  %v1642_v16 = vpop.f32.mrf.mxu1 }
 0x303   :  { %2051 = vst [vmem:[#allocation10 + $0xa8] sm:$0xff] %v1562_v6  ;;  %2053 = vst [vmem:[#allocation10 + $0xb8] sm:$0xff] %v1639_v7  ;;  %v1566_v17 = vadd.f32 %v1565_v24, %v602_v55  ;;  %v1643_v18 = vadd.f32 %v1642_v16, %v610_v56 }
 0x304   :  { %v1567_v21 = vpop.f32.mrf.mxu0  ;;  %v1644_v23 = vpop.f32.mrf.mxu1 }
 0x305   :  { %2084 = vst [vmem:[#allocation10 + $0x1a8] sm:$0xff] %v1566_v17  ;;  %2086 = vst [vmem:[#allocation10 + $0x1b8] sm:$0xff] %v1643_v18  ;;  %v1568_v25 = vadd.f32 %v1567_v21, %v606_v61  ;;  %v1645_v26 = vadd.f32 %v1644_v23, %v614_v62 }
 0x306   :  { %v1713_v29 = vpop.f32.mrf.mxu0  ;;  %v1790_v30 = vpop.f32.mrf.mxu1 }
 0x307   :  { %2085 = vst [vmem:[#allocation10 + $0x1b0] sm:$0xff] %v1568_v25  ;;  %2087 = vst [vmem:[#allocation10 + $0x1c0] sm:$0xff] %v1645_v26  ;;  %v1714_v31 = vadd.f32 %v1713_v29, %v618_v19  ;;  %v1791_v32 = vadd.f32 %v1790_v30, %v626_v20 }
 0x308   :  { %v1715_v33 = vpop.f32.mrf.mxu0  ;;  %v1792_v36 = vpop.f32.mrf.mxu1 }
 0x309   :  { %2054 = vst [vmem:[#allocation10 + $0xc0] sm:$0xff] %v1714_v31  ;;  %2056 = vst [vmem:[#allocation10 + $0xd0] sm:$0xff] %v1791_v32  ;;  %v1716_v38 = vadd.f32 %v1715_v33, %v622_v27  ;;  %v1793_v10 = vadd.f32 %v1792_v36, %v630_v28 }
 0x30a   :  { %v1719_v34 = vpop.f32.mrf.mxu0  ;;  %v1796_v12 = vpop.f32.mrf.mxu1 }
 0x30b   :  { %2055 = vst [vmem:[#allocation10 + $0xc8] sm:$0xff] %v1716_v38  ;;  %2057 = vst [vmem:[#allocation10 + $0xd8] sm:$0xff] %v1793_v10  ;;  %v1720_v35 = vadd.f32 %v1719_v34, %v618_v19  ;;  %v1797_v37 = vadd.f32 %v1796_v12, %v626_v20 }
 0x30c   :  { %v1721_v11 = vpop.f32.mrf.mxu0  ;;  %v1798_v13 = vpop.f32.mrf.mxu1 }
 0x30d   :  { %2088 = vst [vmem:[#allocation10 + $0x1c8] sm:$0xff] %v1720_v35  ;;  %2090 = vst [vmem:[#allocation10 + $0x1d8] sm:$0xff] %v1797_v37  ;;  %v1722_v14 = vadd.f32 %v1721_v11, %v622_v27  ;;  %v1799_v15 = vadd.f32 %v1798_v13, %v630_v28 }
 0x30e   :  { %v1867_v8 = vpop.f32.mrf.mxu0  ;;  %v1944_v45 = vpop.f32.mrf.mxu1 }
 0x30f   :  { %2089 = vst [vmem:[#allocation10 + $0x1d0] sm:$0xff] %v1722_v14  ;;  %2091 = vst [vmem:[#allocation10 + $0x1e0] sm:$0xff] %v1799_v15  ;;  %v1868_v46 = vadd.f32 %v1867_v8, %v634_v39  ;;  %v1945_v47 = vadd.f32 %v1944_v45, %v642_v9 }
 0x310   :  { %v1869_v48 = vpop.f32.mrf.mxu0  ;;  %v1946_v40 = vpop.f32.mrf.mxu1 }
 0x311   :  { %2058 = vst [vmem:[#allocation10 + $0xe0] sm:$0xff] %v1868_v46  ;;  %2060 = vst [vmem:[#allocation10 + $0xf0] sm:$0xff] %v1945_v47  ;;  %v1870_v42 = vadd.f32 %v1869_v48, %v638_v22  ;;  %v1947_v49 = vadd.f32 %v1946_v40, %v646_v44 }
 0x312   :  { %v1873_v50 = vpop.f32.mrf.mxu0  ;;  %v1950_v51 = vpop.f32.mrf.mxu1 }
 0x313   :  { %2059 = vst [vmem:[#allocation10 + $0xe8] sm:$0xff] %v1870_v42  ;;  %2061 = vst [vmem:[#allocation10 + $0xf8] sm:$0xff] %v1947_v49  ;;  %v1874_v52 = vadd.f32 %v1873_v50, %v634_v39  ;;  %v1951_v41 = vadd.f32 %v1950_v51, %v642_v9 }
 0x314   :  { %v1875_v53 = vpop.f32.mrf.mxu0  ;;  %v1952_v43 = vpop.f32.mrf.mxu1 }
 0x315   :  { %2092 = vst [vmem:[#allocation10 + $0x1e8] sm:$0xff] %v1874_v52  ;;  %2094 = vst [vmem:[#allocation10 + $0x1f8] sm:$0xff] %v1951_v41  ;;  %v1876_v55 = vadd.f32 %v1875_v53, %v638_v22  ;;  %v1953_v56 = vadd.f32 %v1952_v43, %v646_v44 }
 0x316   :  { %v2158_v57 = vpop.f32.mrf.mxu0 }
 0x317   :  { %2093 = vst [vmem:[#allocation10 + $0x1f0] sm:$0xff] %v1876_v55  ;;  %2095 = vst [vmem:[#allocation10 + $0x200] sm:$0xff] %v1953_v56  ;;  %v2027_v58 = vadd.f32 %v2158_v57, %v2116_v54 }
 0x318   :  { %v2021_v59 = vpop.f32.mrf.mxu0 }
 0x319   :  { %2096 = vst.msk [vmem:[#allocation10 + $0x208] sm:$0xff] %vm2062_vm1, %v2027_v58  ;;  %v2022_v60 = vadd.f32 %v2116_v54, %v2021_v59 }
 0x31b   :  { %2063 = vst.msk [vmem:[#allocation10 + $0x100] sm:$0xff] %vm2062_vm1, %v2022_v60 }
 0x31c   :  { %2293 = shalt.err (!%p2290_p10)
}
 0x31d   :  { %s2326_s11 = smov 4224   ;;  %s2327_s12 = smov 264  }
 0x31e   :  { %2108 = dma.vmem_to_hbm [thread:$0]  %s2103_s3, 8448, %s2662_s4, [#allocation4], %s2326_s11, %s2326_s11, %s2327_s12  }
 0x31f   :  { %2308 = dma.done.wait [#allocation4], 8448  }
 0x320   :  { %2309 = vsyncadd [#allocation4], 4294958848 }
 0x321   :  { %2112 = vsyncpa [#allocation3], 1 }
 0x322   :  { %2113 = vsyncpa [#allocation6], 1 }
 0x323   :  { %2114 = vsyncpa [#allocation9], 1 }
 0x324   :  { %2115 = vsyncpa [#allocation4], 1 }

</bundles_post_ra>
